<compile_context>
chip_gen: v7x
topology: tpu7x:2x2x1
jax: 0.10.0
libtpu: 0.0.40
codegen_flags: <defaults>
</compile_context>

<pallas_src>
import functools
import math

import jax
import jax.numpy as jnp
from jax.experimental import pallas as pl
from jax.experimental.pallas import tpu as pltpu

VIRTUAL_BS = 8        # BatchNormLocal virtual batch size
BN_EPS = 1e-5
LRELU_SLOPE = 0.2


# ----------------------------- kernel helpers ------------------------------ #

def _lrelu(x):
    return jnp.maximum(x, LRELU_SLOPE * x)


def _bn_local(x2d, gamma, beta):
    """BatchNormLocal for one virtual-batch group.

    x2d: (Bg*N, C) -- rows are (sample-in-group, token) pairs, lanes = channels.
    Single-pass stats (mean / mean-of-squares) + EUP rsqrt; biased variance.
    """
    m = jnp.mean(x2d, axis=0, keepdims=True)            # (1, C)
    m2 = jnp.mean(x2d * x2d, axis=0, keepdims=True)     # (1, C)
    v = jnp.maximum(m2 - m * m, 0.0)
    return (x2d - m) * jax.lax.rsqrt(v + BN_EPS) * gamma + beta


# --------------------------------- kernel ---------------------------------- #

def disc_head_kernel(x_ref, w1_ref, b1_ref, g1_ref, be1_ref,
                     w2_ref, b2_ref, g2_ref, be2_ref,
                     wc_ref, bc_ref, out_ref, *, ksize):
    Bg, N, C = x_ref.shape
    M = Bg * N
    x = x_ref[...]                                                   # (Bg,N,C) f32

    # --- block 1: spectral 1x1 conv (one (M,C)@(C,C) MXU matmul) + BN + LReLU ---
    h1 = jnp.dot(x.reshape(M, C).astype(jnp.bfloat16), w1_ref[...],
                 preferred_element_type=jnp.float32) + b1_ref[...]   # (M, C) f32
    h1 = _lrelu(_bn_local(h1, g1_ref[...], be1_ref[...]))

    # --- block 2 (residual): k=9 circular conv over tokens + BN + LReLU ---
    # Each tap = token-roll (XLU, f32) -> bf16 cast -> (M,C)@(C,C) matmul.
    pad = ksize // 2
    h1_3d = h1.reshape(Bg, N, C)
    acc = jnp.zeros((M, C), jnp.float32)
    for t in range(ksize):
        shift = (pad - t) % N            # xs[b,n,:] = h1[b,(n+t-pad) mod N,:]
        xs = h1_3d if shift == 0 else pltpu.roll(h1_3d, shift, axis=1)
        acc = acc + jnp.dot(xs.reshape(M, C).astype(jnp.bfloat16), w2_ref[t],
                            preferred_element_type=jnp.float32)
    acc = acc + b2_ref[...]
    h2 = _lrelu(_bn_local(acc, g2_ref[...], be2_ref[...]))
    hr = (h2 + h1) * (1.0 / math.sqrt(2.0))                          # residual

    # --- cls: 1x1 conv C -> 1 == per-token dot; VPU multiply + lane reduce ---
    hr_3d = hr.reshape(Bg, N, C)
    out = jnp.sum(hr_3d * wc_ref[...][None], axis=-1) + bc_ref[...]  # (Bg, N)
    out_ref[...] = out.astype(out_ref.dtype)


# -------------------------------- wrapper ----------------------------------- #

def disc_head_forward(feat, params):
    """feat: (B, N, C) float32 hooked block output -> (B, N) float32 logits."""
    B, N, C = feat.shape
    G = int(math.ceil(B / VIRTUAL_BS))
    assert B % G == 0, "BatchNormLocal view requires B divisible by num groups"
    Bg = B // G
    K = int(params["w2"].shape[0])

    # MXU operands in bf16 (f32 accumulation in-kernel); weights pre-transposed
    # to (C_in, C_out) so the kernel does plain (M, C) @ (C, C) matmuls.
    w1t = params["w1"].T.astype(jnp.bfloat16)                          # (C, C)
    w2t = jnp.transpose(params["w2"], (0, 2, 1)).astype(jnp.bfloat16)  # (K, C, C)

    args = (feat, w1t,
            params["b1"], params["g1"], params["be1"],
            w2t,
            params["b2"], params["g2"], params["be2"],
            params["wc"], params["bc"])

    full2d = lambda g: (0, 0)
    in_specs = [
        pl.BlockSpec((Bg, N, C), lambda g: (g, 0, 0)),   # per-group activations
        pl.BlockSpec((C, C), full2d),                    # w1 (bf16)
        pl.BlockSpec((1, C), full2d),                    # b1
        pl.BlockSpec((1, C), full2d),                    # g1
        pl.BlockSpec((1, C), full2d),                    # be1
        pl.BlockSpec((K, C, C), lambda g: (0, 0, 0)),    # w2 (bf16)
        pl.BlockSpec((1, C), full2d),                    # b2
        pl.BlockSpec((1, C), full2d),                    # g2
        pl.BlockSpec((1, C), full2d),                    # be2
        pl.BlockSpec((1, C), full2d),                    # wc
        pl.BlockSpec((1, 1), full2d),                    # bc
    ]
    out_specs = pl.BlockSpec((Bg, N), lambda g: (g, 0))

    flops = 2 * B * N * C * C * (K + 1) + 12 * B * N * C
    bytes_accessed = (B * N * C * 4 + B * N * 4
                      + (K + 1) * C * C * 2 + 8 * C * 4)
    cost = pl.CostEstimate(flops=flops, transcendentals=2 * G * C,
                           bytes_accessed=bytes_accessed)

    # VMEM budget: double-buffered activation tile + a few live f32 activations
    # + resident bf16 weights, with headroom; clamp for v7x's 64 MiB physical.
    act = Bg * N * C * 4
    est = 8 * act + (K + 1) * C * C * 2 + 2 * Bg * N * 4 + (1 << 20)
    vmem_limit = min(max(int(est * 1.5), 32 * 1024 * 1024), 56 * 1024 * 1024)

    kernel = functools.partial(disc_head_kernel, ksize=K)
    return pl.pallas_call(
        kernel,
        out_shape=jax.ShapeDtypeStruct((B, N), jnp.float32),
        grid_spec=pltpu.PrefetchScalarGridSpec(
            num_scalar_prefetch=0,
            grid=(G,),                       # one step per BN virtual-batch group
            in_specs=in_specs,
            out_specs=out_specs,
        ),
        compiler_params=pltpu.CompilerParams(
            dimension_semantics=("parallel",),   # groups independent -> megacore
            vmem_limit_bytes=vmem_limit,
        ),
        cost_estimate=cost,
    )(*args)


def sana_mscm_discriminator_forward(block_features, heads_params):
    """block_features: hooked transformer block outputs, each (B, N, C), consumed
    directly (no external (B,N,C)->(B,C,N) transpose pass).
    Returns concatenated head outputs (B, N * num_heads)."""
    res = [disc_head_forward(feat, params)
           for feat, params in zip(block_features, heads_params)]
    return jnp.concatenate(res, axis=1)


# ------------------------ deterministic parameter setup --------------------- #

def spectral_normalize(w, key, n_power_iterations=1, eps=1e-12):
    # SpectralNorm(dim=0): weight / sigma, sigma via power iteration on (O, -1).
    # TODO(synk): PyTorch SpectralNorm carries a persistent `u` across training
    # steps; here a one-shot power iteration at init approximates it.
    O = w.shape[0]
    w_mat = w.reshape(O, -1)
    u = jax.random.normal(key, (O,), dtype=jnp.float32)
    u = u / (jnp.linalg.norm(u) + eps)
    v = None
    for _ in range(n_power_iterations):
        v = w_mat.T @ u
        v = v / (jnp.linalg.norm(v) + eps)
        u = w_mat @ v
        u = u / (jnp.linalg.norm(u) + eps)
    sigma = u @ (w_mat @ v)
    return w / sigma


def init_head_params(key, C, ksize=9):
    ks = jax.random.split(key, 8)

    def conv_w(k, o, c, t):
        fan_in = c * t
        return jax.random.normal(k, (o, c, t), jnp.float32) / math.sqrt(fan_in)

    w1 = spectral_normalize(conv_w(ks[0], C, C, 1), ks[1])       # (C, C, 1)
    w2 = spectral_normalize(conv_w(ks[2], C, C, ksize), ks[3])   # (C, C, K)
    wc = spectral_normalize(conv_w(ks[4], 1, C, 1), ks[5])       # (1, C, 1)

    return {
        "w1": w1[:, :, 0],                                  # (C_out, C_in)
        "b1": 0.01 * jax.random.normal(ks[6], (1, C), jnp.float32),
        "g1": jnp.ones((1, C), jnp.float32),                # BN affine weight
        "be1": jnp.zeros((1, C), jnp.float32),              # BN affine bias
        "w2": jnp.transpose(w2, (2, 0, 1)),                 # (K, C_out, C_in)
        "b2": 0.01 * jax.random.normal(ks[7], (1, C), jnp.float32),
        "g2": jnp.ones((1, C), jnp.float32),
        "be2": jnp.zeros((1, C), jnp.float32),
        "wc": wc[:, :, 0],                                  # (1, C_in)
        "bc": jnp.zeros((1, 1), jnp.float32),
    }


# ------------------------- pure-JAX f32 reference --------------------------- #

def _bn_ref(x, gamma, beta, G):
    B, N, C = x.shape
    xg = x.reshape(G, B // G, N, C)
    m = jnp.mean(xg, axis=(1, 2), keepdims=True)
    v = jnp.mean(jnp.square(xg - m), axis=(1, 2), keepdims=True)
    xn = ((xg - m) / jnp.sqrt(v + BN_EPS)).reshape(B, N, C)
    return xn * gamma.reshape(1, 1, C) + beta.reshape(1, 1, C)


def disc_head_reference(feat, params):
    B, N, C = feat.shape
    G = int(math.ceil(B / VIRTUAL_BS))
    K = params["w2"].shape[0]
    pad = K // 2
    h1 = jnp.einsum("bnc,oc->bno", feat, params["w1"]) + params["b1"].reshape(1, 1, C)
    h1 = _lrelu(_bn_ref(h1, params["g1"], params["be1"], G))
    acc = jnp.zeros_like(h1)
    for t in range(K):
        acc = acc + jnp.einsum("bnc,oc->bno", jnp.roll(h1, pad - t, axis=1),
                               params["w2"][t])
    acc = acc + params["b2"].reshape(1, 1, C)
    h2 = _lrelu(_bn_ref(acc, params["g2"], params["be2"], G))
    hr = (h2 + h1) * (1.0 / math.sqrt(2.0))
    return jnp.einsum("bnc,c->bn", hr, params["wc"].reshape(C)) + params["bc"].reshape(())


# ----------------------------------- main ----------------------------------- #

if __name__ == "__main__":
    key = jax.random.PRNGKey(0)
    B, N, C = 2, 64, 32   # batch, tokens, transformer hidden_size
    k_feat, k_params = jax.random.split(key)

    # Hooked transformer block output (is_multiscale=False -> single head).
    feat = jax.random.normal(k_feat, (B, N, C), jnp.float32)
    params = init_head_params(k_params, C, ksize=9)

    out = sana_mscm_discriminator_forward([feat], [params])
    out = jax.block_until_ready(out)
    assert out.shape == (B, N) and out.dtype == jnp.float32
    assert bool(jnp.all(jnp.isfinite(out)))

    # Numerical check vs. pure-JAX f32 reference (bf16 MXU path -> loose tol).
    ref = disc_head_reference(feat, params)
    max_err = float(jnp.max(jnp.abs(out - ref)))
    assert max_err < 1e-1, f"kernel vs reference mismatch: {max_err}"
    print("KERNEL_OK")
</pallas_src>

<mosaic_0001>
module attributes {stable_mosaic.version = 11 : i64} {
  func.func @disc_head_kernel(%arg0: i32, %arg1: memref<2x64x32xf32, #tpu.memory_space<vmem>>, %arg2: memref<32x32xbf16, #tpu.memory_space<vmem>>, %arg3: memref<1x32xf32, #tpu.memory_space<vmem>>, %arg4: memref<1x32xf32, #tpu.memory_space<vmem>>, %arg5: memref<1x32xf32, #tpu.memory_space<vmem>>, %arg6: memref<9x32x32xbf16, #tpu.memory_space<vmem>>, %arg7: memref<1x32xf32, #tpu.memory_space<vmem>>, %arg8: memref<1x32xf32, #tpu.memory_space<vmem>>, %arg9: memref<1x32xf32, #tpu.memory_space<vmem>>, %arg10: memref<1x32xf32, #tpu.memory_space<vmem>>, %arg11: memref<1x1xf32, #tpu.memory_space<vmem>>, %arg12: memref<2x64xf32, #tpu.memory_space<vmem>>) attributes {dimension_semantics = [#tpu.dimension_semantics<parallel>], iteration_bounds = array<i64: 1>, scalar_prefetch = 0 : i64, scratch_operands = 0 : i64, tpu.core_type = #tpu.core_type<tc>, window_params = [{transform_indices = @transform_0, window_bounds = array<i64: 2, 64, 32>}, {pipeline_mode = #tpu.pipeline_mode<synchronous>, transform_indices = @transform_1, window_bounds = array<i64: 32, 32>}, {pipeline_mode = #tpu.pipeline_mode<synchronous>, transform_indices = @transform_2, window_bounds = array<i64: 1, 32>}, {pipeline_mode = #tpu.pipeline_mode<synchronous>, transform_indices = @transform_3, window_bounds = array<i64: 1, 32>}, {pipeline_mode = #tpu.pipeline_mode<synchronous>, transform_indices = @transform_4, window_bounds = array<i64: 1, 32>}, {pipeline_mode = #tpu.pipeline_mode<synchronous>, transform_indices = @transform_5, window_bounds = array<i64: 9, 32, 32>}, {pipeline_mode = #tpu.pipeline_mode<synchronous>, transform_indices = @transform_6, window_bounds = array<i64: 1, 32>}, {pipeline_mode = #tpu.pipeline_mode<synchronous>, transform_indices = @transform_7, window_bounds = array<i64: 1, 32>}, {pipeline_mode = #tpu.pipeline_mode<synchronous>, transform_indices = @transform_8, window_bounds = array<i64: 1, 32>}, {pipeline_mode = #tpu.pipeline_mode<synchronous>, transform_indices = @transform_9, window_bounds = array<i64: 1, 32>}, {pipeline_mode = #tpu.pipeline_mode<synchronous>, transform_indices = @transform_10, window_bounds = array<i64: 1, 1>}, {transform_indices = @transform_11, window_bounds = array<i64: 2, 64>}]} {
    %c0 = arith.constant 0 : index
    %c0_0 = arith.constant 0 : index
    %c0_1 = arith.constant 0 : index
    %0 = vector.load %arg1[%c0, %c0_0, %c0_1] : memref<2x64x32xf32, #tpu.memory_space<vmem>>, vector<2x64x32xf32>
    %1 = vector.shape_cast %0 : vector<2x64x32xf32> to vector<128x32xf32>
    %2 = arith.truncf %1 : vector<128x32xf32> to vector<128x32xbf16>
    %c0_2 = arith.constant 0 : index
    %c0_3 = arith.constant 0 : index
    %3 = vector.load %arg2[%c0_2, %c0_3] : memref<32x32xbf16, #tpu.memory_space<vmem>>, vector<32x32xbf16>
    %cst = arith.constant dense<0.000000e+00> : vector<128x32xf32>
    %4 = tpu.matmul %2, %3, %cst {dimension_numbers = #tpu.dot_dimension_numbers<[1], [0], [0], [1], [0, 0, 1, 1], [], []>} : vector<128x32xbf16>, vector<32x32xbf16>, vector<128x32xf32> -> vector<128x32xf32>
    %c0_4 = arith.constant 0 : index
    %c0_5 = arith.constant 0 : index
    %5 = vector.load %arg3[%c0_4, %c0_5] : memref<1x32xf32, #tpu.memory_space<vmem>>, vector<1x32xf32>
    %6 = vector.broadcast %5 : vector<1x32xf32> to vector<128x32xf32>
    %7 = arith.addf %4, %6 : vector<128x32xf32>
    %c0_6 = arith.constant 0 : index
    %c0_7 = arith.constant 0 : index
    %8 = vector.load %arg4[%c0_6, %c0_7] : memref<1x32xf32, #tpu.memory_space<vmem>>, vector<1x32xf32>
    %c0_8 = arith.constant 0 : index
    %c0_9 = arith.constant 0 : index
    %9 = vector.load %arg5[%c0_8, %c0_9] : memref<1x32xf32, #tpu.memory_space<vmem>>, vector<1x32xf32>
    %cst_10 = arith.constant dense<0.000000e+00> : vector<32xf32>
    %10 = vector.multi_reduction <add>, %7, %cst_10 [0] : vector<128x32xf32> to vector<32xf32>
    %11 = vector.shape_cast %10 : vector<32xf32> to vector<1x32xf32>
    %cst_11 = arith.constant 1.280000e+02 : f32
    %12 = vector.broadcast %cst_11 : f32 to vector<1x32xf32>
    %13 = arith.divf %11, %12 : vector<1x32xf32>
    %14 = arith.mulf %7, %7 : vector<128x32xf32>
    %cst_12 = arith.constant dense<0.000000e+00> : vector<32xf32>
    %15 = vector.multi_reduction <add>, %14, %cst_12 [0] : vector<128x32xf32> to vector<32xf32>
    %16 = vector.shape_cast %15 : vector<32xf32> to vector<1x32xf32>
    %cst_13 = arith.constant 1.280000e+02 : f32
    %17 = vector.broadcast %cst_13 : f32 to vector<1x32xf32>
    %18 = arith.divf %16, %17 : vector<1x32xf32>
    %19 = arith.mulf %13, %13 : vector<1x32xf32>
    %20 = arith.subf %18, %19 : vector<1x32xf32>
    %cst_14 = arith.constant 0.000000e+00 : f32
    %21 = vector.broadcast %cst_14 : f32 to vector<1x32xf32>
    %22 = arith.maximumf %20, %21 : vector<1x32xf32>
    %23 = vector.broadcast %13 : vector<1x32xf32> to vector<128x32xf32>
    %24 = arith.subf %7, %23 : vector<128x32xf32>
    %cst_15 = arith.constant 9.99999974E-6 : f32
    %25 = vector.broadcast %cst_15 : f32 to vector<1x32xf32>
    %26 = arith.addf %22, %25 : vector<1x32xf32>
    %27 = math.rsqrt %26 : vector<1x32xf32>
    %28 = vector.broadcast %27 : vector<1x32xf32> to vector<128x32xf32>
    %29 = arith.mulf %24, %28 : vector<128x32xf32>
    %30 = vector.broadcast %8 : vector<1x32xf32> to vector<128x32xf32>
    %31 = arith.mulf %29, %30 : vector<128x32xf32>
    %32 = vector.broadcast %9 : vector<1x32xf32> to vector<128x32xf32>
    %33 = arith.addf %31, %32 : vector<128x32xf32>
    %cst_16 = arith.constant 2.000000e-01 : f32
    %34 = vector.broadcast %cst_16 : f32 to vector<128x32xf32>
    %35 = arith.mulf %34, %33 : vector<128x32xf32>
    %36 = arith.maximumf %33, %35 : vector<128x32xf32>
    %37 = vector.shape_cast %36 : vector<128x32xf32> to vector<2x64x32xf32>
    %cst_17 = arith.constant 0.000000e+00 : f32
    %38 = vector.broadcast %cst_17 : f32 to vector<128x32xf32>
    %c4_i32 = arith.constant 4 : i32
    %39 = tpu.dynamic_rotate %37 by %c4_i32 dim 1 : vector<2x64x32xf32>, i32 -> vector<2x64x32xf32>
    %40 = vector.shape_cast %39 : vector<2x64x32xf32> to vector<128x32xf32>
    %41 = arith.truncf %40 : vector<128x32xf32> to vector<128x32xbf16>
    %c0_18 = arith.constant 0 : index
    %c0_19 = arith.constant 0 : index
    %c0_20 = arith.constant 0 : index
    %42 = vector.load %arg6[%c0_18, %c0_19, %c0_20] : memref<9x32x32xbf16, #tpu.memory_space<vmem>>, vector<1x32x32xbf16>
    %43 = vector.shape_cast %42 : vector<1x32x32xbf16> to vector<32x32xbf16>
    %cst_21 = arith.constant dense<0.000000e+00> : vector<128x32xf32>
    %44 = tpu.matmul %41, %43, %cst_21 {dimension_numbers = #tpu.dot_dimension_numbers<[1], [0], [0], [1], [0, 0, 1, 1], [], []>} : vector<128x32xbf16>, vector<32x32xbf16>, vector<128x32xf32> -> vector<128x32xf32>
    %45 = arith.addf %38, %44 : vector<128x32xf32>
    %c3_i32 = arith.constant 3 : i32
    %46 = tpu.dynamic_rotate %37 by %c3_i32 dim 1 : vector<2x64x32xf32>, i32 -> vector<2x64x32xf32>
    %47 = vector.shape_cast %46 : vector<2x64x32xf32> to vector<128x32xf32>
    %48 = arith.truncf %47 : vector<128x32xf32> to vector<128x32xbf16>
    %c1 = arith.constant 1 : index
    %c0_22 = arith.constant 0 : index
    %c0_23 = arith.constant 0 : index
    %49 = vector.load %arg6[%c1, %c0_22, %c0_23] : memref<9x32x32xbf16, #tpu.memory_space<vmem>>, vector<1x32x32xbf16>
    %50 = vector.shape_cast %49 : vector<1x32x32xbf16> to vector<32x32xbf16>
    %cst_24 = arith.constant dense<0.000000e+00> : vector<128x32xf32>
    %51 = tpu.matmul %48, %50, %cst_24 {dimension_numbers = #tpu.dot_dimension_numbers<[1], [0], [0], [1], [0, 0, 1, 1], [], []>} : vector<128x32xbf16>, vector<32x32xbf16>, vector<128x32xf32> -> vector<128x32xf32>
    %52 = arith.addf %45, %51 : vector<128x32xf32>
    %c2_i32 = arith.constant 2 : i32
    %53 = tpu.dynamic_rotate %37 by %c2_i32 dim 1 : vector<2x64x32xf32>, i32 -> vector<2x64x32xf32>
    %54 = vector.shape_cast %53 : vector<2x64x32xf32> to vector<128x32xf32>
    %55 = arith.truncf %54 : vector<128x32xf32> to vector<128x32xbf16>
    %c2 = arith.constant 2 : index
    %c0_25 = arith.constant 0 : index
    %c0_26 = arith.constant 0 : index
    %56 = vector.load %arg6[%c2, %c0_25, %c0_26] : memref<9x32x32xbf16, #tpu.memory_space<vmem>>, vector<1x32x32xbf16>
    %57 = vector.shape_cast %56 : vector<1x32x32xbf16> to vector<32x32xbf16>
    %cst_27 = arith.constant dense<0.000000e+00> : vector<128x32xf32>
    %58 = tpu.matmul %55, %57, %cst_27 {dimension_numbers = #tpu.dot_dimension_numbers<[1], [0], [0], [1], [0, 0, 1, 1], [], []>} : vector<128x32xbf16>, vector<32x32xbf16>, vector<128x32xf32> -> vector<128x32xf32>
    %59 = arith.addf %52, %58 : vector<128x32xf32>
    %c1_i32 = arith.constant 1 : i32
    %60 = tpu.dynamic_rotate %37 by %c1_i32 dim 1 : vector<2x64x32xf32>, i32 -> vector<2x64x32xf32>
    %61 = vector.shape_cast %60 : vector<2x64x32xf32> to vector<128x32xf32>
    %62 = arith.truncf %61 : vector<128x32xf32> to vector<128x32xbf16>
    %c3 = arith.constant 3 : index
    %c0_28 = arith.constant 0 : index
    %c0_29 = arith.constant 0 : index
    %63 = vector.load %arg6[%c3, %c0_28, %c0_29] : memref<9x32x32xbf16, #tpu.memory_space<vmem>>, vector<1x32x32xbf16>
    %64 = vector.shape_cast %63 : vector<1x32x32xbf16> to vector<32x32xbf16>
    %cst_30 = arith.constant dense<0.000000e+00> : vector<128x32xf32>
    %65 = tpu.matmul %62, %64, %cst_30 {dimension_numbers = #tpu.dot_dimension_numbers<[1], [0], [0], [1], [0, 0, 1, 1], [], []>} : vector<128x32xbf16>, vector<32x32xbf16>, vector<128x32xf32> -> vector<128x32xf32>
    %66 = arith.addf %59, %65 : vector<128x32xf32>
    %67 = vector.shape_cast %37 : vector<2x64x32xf32> to vector<128x32xf32>
    %68 = arith.truncf %67 : vector<128x32xf32> to vector<128x32xbf16>
    %c4 = arith.constant 4 : index
    %c0_31 = arith.constant 0 : index
    %c0_32 = arith.constant 0 : index
    %69 = vector.load %arg6[%c4, %c0_31, %c0_32] : memref<9x32x32xbf16, #tpu.memory_space<vmem>>, vector<1x32x32xbf16>
    %70 = vector.shape_cast %69 : vector<1x32x32xbf16> to vector<32x32xbf16>
    %cst_33 = arith.constant dense<0.000000e+00> : vector<128x32xf32>
    %71 = tpu.matmul %68, %70, %cst_33 {dimension_numbers = #tpu.dot_dimension_numbers<[1], [0], [0], [1], [0, 0, 1, 1], [], []>} : vector<128x32xbf16>, vector<32x32xbf16>, vector<128x32xf32> -> vector<128x32xf32>
    %72 = arith.addf %66, %71 : vector<128x32xf32>
    %c63_i32 = arith.constant 63 : i32
    %73 = tpu.dynamic_rotate %37 by %c63_i32 dim 1 : vector<2x64x32xf32>, i32 -> vector<2x64x32xf32>
    %74 = vector.shape_cast %73 : vector<2x64x32xf32> to vector<128x32xf32>
    %75 = arith.truncf %74 : vector<128x32xf32> to vector<128x32xbf16>
    %c5 = arith.constant 5 : index
    %c0_34 = arith.constant 0 : index
    %c0_35 = arith.constant 0 : index
    %76 = vector.load %arg6[%c5, %c0_34, %c0_35] : memref<9x32x32xbf16, #tpu.memory_space<vmem>>, vector<1x32x32xbf16>
    %77 = vector.shape_cast %76 : vector<1x32x32xbf16> to vector<32x32xbf16>
    %cst_36 = arith.constant dense<0.000000e+00> : vector<128x32xf32>
    %78 = tpu.matmul %75, %77, %cst_36 {dimension_numbers = #tpu.dot_dimension_numbers<[1], [0], [0], [1], [0, 0, 1, 1], [], []>} : vector<128x32xbf16>, vector<32x32xbf16>, vector<128x32xf32> -> vector<128x32xf32>
    %79 = arith.addf %72, %78 : vector<128x32xf32>
    %c62_i32 = arith.constant 62 : i32
    %80 = tpu.dynamic_rotate %37 by %c62_i32 dim 1 : vector<2x64x32xf32>, i32 -> vector<2x64x32xf32>
    %81 = vector.shape_cast %80 : vector<2x64x32xf32> to vector<128x32xf32>
    %82 = arith.truncf %81 : vector<128x32xf32> to vector<128x32xbf16>
    %c6 = arith.constant 6 : index
    %c0_37 = arith.constant 0 : index
    %c0_38 = arith.constant 0 : index
    %83 = vector.load %arg6[%c6, %c0_37, %c0_38] : memref<9x32x32xbf16, #tpu.memory_space<vmem>>, vector<1x32x32xbf16>
    %84 = vector.shape_cast %83 : vector<1x32x32xbf16> to vector<32x32xbf16>
    %cst_39 = arith.constant dense<0.000000e+00> : vector<128x32xf32>
    %85 = tpu.matmul %82, %84, %cst_39 {dimension_numbers = #tpu.dot_dimension_numbers<[1], [0], [0], [1], [0, 0, 1, 1], [], []>} : vector<128x32xbf16>, vector<32x32xbf16>, vector<128x32xf32> -> vector<128x32xf32>
    %86 = arith.addf %79, %85 : vector<128x32xf32>
    %c61_i32 = arith.constant 61 : i32
    %87 = tpu.dynamic_rotate %37 by %c61_i32 dim 1 : vector<2x64x32xf32>, i32 -> vector<2x64x32xf32>
    %88 = vector.shape_cast %87 : vector<2x64x32xf32> to vector<128x32xf32>
    %89 = arith.truncf %88 : vector<128x32xf32> to vector<128x32xbf16>
    %c7 = arith.constant 7 : index
    %c0_40 = arith.constant 0 : index
    %c0_41 = arith.constant 0 : index
    %90 = vector.load %arg6[%c7, %c0_40, %c0_41] : memref<9x32x32xbf16, #tpu.memory_space<vmem>>, vector<1x32x32xbf16>
    %91 = vector.shape_cast %90 : vector<1x32x32xbf16> to vector<32x32xbf16>
    %cst_42 = arith.constant dense<0.000000e+00> : vector<128x32xf32>
    %92 = tpu.matmul %89, %91, %cst_42 {dimension_numbers = #tpu.dot_dimension_numbers<[1], [0], [0], [1], [0, 0, 1, 1], [], []>} : vector<128x32xbf16>, vector<32x32xbf16>, vector<128x32xf32> -> vector<128x32xf32>
    %93 = arith.addf %86, %92 : vector<128x32xf32>
    %c60_i32 = arith.constant 60 : i32
    %94 = tpu.dynamic_rotate %37 by %c60_i32 dim 1 : vector<2x64x32xf32>, i32 -> vector<2x64x32xf32>
    %95 = vector.shape_cast %94 : vector<2x64x32xf32> to vector<128x32xf32>
    %96 = arith.truncf %95 : vector<128x32xf32> to vector<128x32xbf16>
    %c8 = arith.constant 8 : index
    %c0_43 = arith.constant 0 : index
    %c0_44 = arith.constant 0 : index
    %97 = vector.load %arg6[%c8, %c0_43, %c0_44] : memref<9x32x32xbf16, #tpu.memory_space<vmem>>, vector<1x32x32xbf16>
    %98 = vector.shape_cast %97 : vector<1x32x32xbf16> to vector<32x32xbf16>
    %cst_45 = arith.constant dense<0.000000e+00> : vector<128x32xf32>
    %99 = tpu.matmul %96, %98, %cst_45 {dimension_numbers = #tpu.dot_dimension_numbers<[1], [0], [0], [1], [0, 0, 1, 1], [], []>} : vector<128x32xbf16>, vector<32x32xbf16>, vector<128x32xf32> -> vector<128x32xf32>
    %100 = arith.addf %93, %99 : vector<128x32xf32>
    %c0_46 = arith.constant 0 : index
    %c0_47 = arith.constant 0 : index
    %101 = vector.load %arg7[%c0_46, %c0_47] : memref<1x32xf32, #tpu.memory_space<vmem>>, vector<1x32xf32>
    %102 = vector.broadcast %101 : vector<1x32xf32> to vector<128x32xf32>
    %103 = arith.addf %100, %102 : vector<128x32xf32>
    %c0_48 = arith.constant 0 : index
    %c0_49 = arith.constant 0 : index
    %104 = vector.load %arg8[%c0_48, %c0_49] : memref<1x32xf32, #tpu.memory_space<vmem>>, vector<1x32xf32>
    %c0_50 = arith.constant 0 : index
    %c0_51 = arith.constant 0 : index
    %105 = vector.load %arg9[%c0_50, %c0_51] : memref<1x32xf32, #tpu.memory_space<vmem>>, vector<1x32xf32>
    %cst_52 = arith.constant dense<0.000000e+00> : vector<32xf32>
    %106 = vector.multi_reduction <add>, %103, %cst_52 [0] : vector<128x32xf32> to vector<32xf32>
    %107 = vector.shape_cast %106 : vector<32xf32> to vector<1x32xf32>
    %cst_53 = arith.constant 1.280000e+02 : f32
    %108 = vector.broadcast %cst_53 : f32 to vector<1x32xf32>
    %109 = arith.divf %107, %108 : vector<1x32xf32>
    %110 = arith.mulf %103, %103 : vector<128x32xf32>
    %cst_54 = arith.constant dense<0.000000e+00> : vector<32xf32>
    %111 = vector.multi_reduction <add>, %110, %cst_54 [0] : vector<128x32xf32> to vector<32xf32>
    %112 = vector.shape_cast %111 : vector<32xf32> to vector<1x32xf32>
    %cst_55 = arith.constant 1.280000e+02 : f32
    %113 = vector.broadcast %cst_55 : f32 to vector<1x32xf32>
    %114 = arith.divf %112, %113 : vector<1x32xf32>
    %115 = arith.mulf %109, %109 : vector<1x32xf32>
    %116 = arith.subf %114, %115 : vector<1x32xf32>
    %cst_56 = arith.constant 0.000000e+00 : f32
    %117 = vector.broadcast %cst_56 : f32 to vector<1x32xf32>
    %118 = arith.maximumf %116, %117 : vector<1x32xf32>
    %119 = vector.broadcast %109 : vector<1x32xf32> to vector<128x32xf32>
    %120 = arith.subf %103, %119 : vector<128x32xf32>
    %cst_57 = arith.constant 9.99999974E-6 : f32
    %121 = vector.broadcast %cst_57 : f32 to vector<1x32xf32>
    %122 = arith.addf %118, %121 : vector<1x32xf32>
    %123 = math.rsqrt %122 : vector<1x32xf32>
    %124 = vector.broadcast %123 : vector<1x32xf32> to vector<128x32xf32>
    %125 = arith.mulf %120, %124 : vector<128x32xf32>
    %126 = vector.broadcast %104 : vector<1x32xf32> to vector<128x32xf32>
    %127 = arith.mulf %125, %126 : vector<128x32xf32>
    %128 = vector.broadcast %105 : vector<1x32xf32> to vector<128x32xf32>
    %129 = arith.addf %127, %128 : vector<128x32xf32>
    %cst_58 = arith.constant 2.000000e-01 : f32
    %130 = vector.broadcast %cst_58 : f32 to vector<128x32xf32>
    %131 = arith.mulf %130, %129 : vector<128x32xf32>
    %132 = arith.maximumf %129, %131 : vector<128x32xf32>
    %133 = arith.addf %132, %36 : vector<128x32xf32>
    %cst_59 = arith.constant 0.707106769 : f32
    %134 = vector.broadcast %cst_59 : f32 to vector<128x32xf32>
    %135 = arith.mulf %133, %134 : vector<128x32xf32>
    %136 = vector.shape_cast %135 : vector<128x32xf32> to vector<2x64x32xf32>
    %c0_60 = arith.constant 0 : index
    %c0_61 = arith.constant 0 : index
    %137 = vector.load %arg10[%c0_60, %c0_61] : memref<1x32xf32, #tpu.memory_space<vmem>>, vector<1x32xf32>
    %138 = vector.shape_cast %137 : vector<1x32xf32> to vector<1x1x32xf32>
    %139 = vector.broadcast %138 : vector<1x1x32xf32> to vector<2x64x32xf32>
    %140 = arith.mulf %136, %139 : vector<2x64x32xf32>
    %cst_62 = arith.constant dense<0.000000e+00> : vector<2x64xf32>
    %141 = vector.multi_reduction <add>, %140, %cst_62 [2] : vector<2x64x32xf32> to vector<2x64xf32>
    %c0_63 = arith.constant 0 : index
    %c0_64 = arith.constant 0 : index
    %142 = vector.load %arg11[%c0_63, %c0_64] : memref<1x1xf32, #tpu.memory_space<vmem>>, vector<1x1xf32>
    %143 = vector.broadcast %142 : vector<1x1xf32> to vector<2x64xf32>
    %144 = arith.addf %141, %143 : vector<2x64xf32>
    %c0_65 = arith.constant 0 : index
    %c0_66 = arith.constant 0 : index
    %145 = vector.load %arg12[%c0_65, %c0_66] : memref<2x64xf32, #tpu.memory_space<vmem>>, vector<2x64xf32>
    tpu.vector_store %arg12[%c0_65, %c0_66], %144 {strides = array<i32>} : memref<2x64xf32, #tpu.memory_space<vmem>>, vector<2x64xf32>,
    return
  }
  func.func @transform_0(%arg0: i32) -> (i32, i32, i32) {
    %c0_i32 = arith.constant 0 : i32
    %c0_i32_0 = arith.constant 0 : i32
    %c0_i32_1 = arith.constant 0 : i32
    return %arg0, %c0_i32, %c0_i32_0 : i32, i32, i32
  }
  func.func @transform_1(%arg0: i32) -> (i32, i32) {
    %c0_i32 = arith.constant 0 : i32
    %c0_i32_0 = arith.constant 0 : i32
    %c0_i32_1 = arith.constant 0 : i32
    return %c0_i32, %c0_i32_0 : i32, i32
  }
  func.func @transform_2(%arg0: i32) -> (i32, i32) {
    %c0_i32 = arith.constant 0 : i32
    %c0_i32_0 = arith.constant 0 : i32
    %c0_i32_1 = arith.constant 0 : i32
    return %c0_i32, %c0_i32_0 : i32, i32
  }
  func.func @transform_3(%arg0: i32) -> (i32, i32) {
    %c0_i32 = arith.constant 0 : i32
    %c0_i32_0 = arith.constant 0 : i32
    %c0_i32_1 = arith.constant 0 : i32
    return %c0_i32, %c0_i32_0 : i32, i32
  }
  func.func @transform_4(%arg0: i32) -> (i32, i32) {
    %c0_i32 = arith.constant 0 : i32
    %c0_i32_0 = arith.constant 0 : i32
    %c0_i32_1 = arith.constant 0 : i32
    return %c0_i32, %c0_i32_0 : i32, i32
  }
  func.func @transform_5(%arg0: i32) -> (i32, i32, i32) {
    %c0_i32 = arith.constant 0 : i32
    %c0_i32_0 = arith.constant 0 : i32
    %c0_i32_1 = arith.constant 0 : i32
    %c0_i32_2 = arith.constant 0 : i32
    return %c0_i32, %c0_i32_0, %c0_i32_1 : i32, i32, i32
  }
  func.func @transform_6(%arg0: i32) -> (i32, i32) {
    %c0_i32 = arith.constant 0 : i32
    %c0_i32_0 = arith.constant 0 : i32
    %c0_i32_1 = arith.constant 0 : i32
    return %c0_i32, %c0_i32_0 : i32, i32
  }
  func.func @transform_7(%arg0: i32) -> (i32, i32) {
    %c0_i32 = arith.constant 0 : i32
    %c0_i32_0 = arith.constant 0 : i32
    %c0_i32_1 = arith.constant 0 : i32
    return %c0_i32, %c0_i32_0 : i32, i32
  }
  func.func @transform_8(%arg0: i32) -> (i32, i32) {
    %c0_i32 = arith.constant 0 : i32
    %c0_i32_0 = arith.constant 0 : i32
    %c0_i32_1 = arith.constant 0 : i32
    return %c0_i32, %c0_i32_0 : i32, i32
  }
  func.func @transform_9(%arg0: i32) -> (i32, i32) {
    %c0_i32 = arith.constant 0 : i32
    %c0_i32_0 = arith.constant 0 : i32
    %c0_i32_1 = arith.constant 0 : i32
    return %c0_i32, %c0_i32_0 : i32, i32
  }
  func.func @transform_10(%arg0: i32) -> (i32, i32) {
    %c0_i32 = arith.constant 0 : i32
    %c0_i32_0 = arith.constant 0 : i32
    %c0_i32_1 = arith.constant 0 : i32
    return %c0_i32, %c0_i32_0 : i32, i32
  }
  func.func @transform_11(%arg0: i32) -> (i32, i32) {
    %c0_i32 = arith.constant 0 : i32
    %c0_i32_0 = arith.constant 0 : i32
    return %arg0, %c0_i32 : i32, i32
  }
}

</mosaic_0001>

<bundles_post_ra>
// kernel: tpu_custom_call.1
= control target key start
LH: loop header
LB: loop body
LE: loop exit
PB: predicated region body
PF: predicated region fallthrough
CT: control target
= control target key end

     0   :  { %s4572_s0 = inlined_call_operand.vmem [shape: f32[2,64,32], index: 0, kind: input, shape index: {}]   ;;  %s4573_s1 = inlined_call_operand.vmem [shape: bf16[32,32], index: 1, kind: input, shape index: {}]   ;;  %s4574_s2 = inlined_call_operand.vmem [shape: f32[1,32], index: 2, kind: input, shape index: {}]   ;;  %s4575_s3 = inlined_call_operand.vmem [shape: f32[1,32], index: 3, kind: input, shape index: {}]   ;;  %s4576_s4 = inlined_call_operand.vmem [shape: f32[1,32], index: 4, kind: input, shape index: {}]   ;;  %s4577_s5 = inlined_call_operand.vmem [shape: bf16[9,32,32], index: 5, kind: input, shape index: {}]   ;;  %s4578_s6 = inlined_call_operand.vmem [shape: f32[1,32], index: 6, kind: input, shape index: {}]   ;;  %s4579_s7 = inlined_call_operand.vmem [shape: f32[1,32], index: 7, kind: input, shape index: {}]   ;;  %s4580_s8 = inlined_call_operand.vmem [shape: f32[1,32], index: 8, kind: input, shape index: {}]   ;;  %s4581_s9 = inlined_call_operand.vmem [shape: f32[1,32], index: 9, kind: input, shape index: {}]   ;;  %s4582_s10 = inlined_call_operand.<no memory space> [shape: f32[1,1], index: 10, kind: input, shape index: {}]   ;;  %s4583_s11 = inlined_call_operand.hbm [shape: f32[2,64], index: 11, kind: output, shape index: {}]  }
   0x1   :  { %v16_v0 = vstv %s4582_s10 }
   0x2   :  { %17 = vst [vmem:[#allocation2] sm:$0x1] %v16_v0 }
   0x3   :  { %v3136_v1 = vld [vmem:[%s4573_s1] sm:$0xff]   ;;  %v3137_v2 = vld [vmem:[%s4573_s1 + $0x8] sm:$0xff]   ;;  %vm89_vm0 = vcmask 261120   ;;  %v44_v6 = vld [vmem:[%s4572_s0 + $0x10] sm:$0xff] }
   0x4   :  { %2805 = vmatprep.subr.bf16.mxu0 %v3136_v1  ;;  %v42_v3 = vld [vmem:[%s4572_s0] sm:$0xff]  ;;  %v43_v4 = vld [vmem:[%s4572_s0 + $0x8] sm:$0xff]  ;;  %v45_v7 = vld [vmem:[%s4572_s0 + $0x18] sm:$0xff] }
   0x5   :  { %2806 = vmatpush3.bf16.msra.mxu0 %v3136_v1  ;;  %v58_v5 = vpack.c.bf16 %v43_v4, %v42_v3  ;;  %v46_v8 = vld [vmem:[%s4572_s0 + $0x20] sm:$0xff]  ;;  %v47_v9 = vld [vmem:[%s4572_s0 + $0x28] sm:$0xff]  ;;  %v59_v10 = vpack.c.bf16 %v45_v7, %v44_v6  ;;  %v48_v12 = vld [vmem:[%s4572_s0 + $0x30] sm:$0xff] }
   0x6   :  { %2807 = vmatprep.subr.bf16.mxu0 %v3137_v2  ;;  %v60_v11 = vpack.c.bf16 %v47_v9, %v46_v8  ;;  %v49_v13 = vld [vmem:[%s4572_s0 + $0x38] sm:$0xff]  ;;  %v50_v14 = vld [vmem:[%s4572_s0 + $0x40] sm:$0xff]  ;;  %v51_v15 = vld [vmem:[%s4572_s0 + $0x48] sm:$0xff] }
   0x7   :  { %2809 = vmatprep.mubr.msk.bf16.mxu0 %vm89_vm0, %v58_v5  ;;  %v61_v16 = vpack.c.bf16 %v49_v13, %v48_v12  ;;  %v62_v17 = vpack.c.bf16 %v51_v15, %v50_v14  ;;  %v52_v18 = vld [vmem:[%s4572_s0 + $0x50] sm:$0xff]  ;;  %v53_v19 = vld [vmem:[%s4572_s0 + $0x58] sm:$0xff] }
   0x9   :  { %2808 = vmatpush3.bf16.msra.mxu0 %v3137_v2 }
   0xc   :  { %2810 = vmatmul.mubr.msk.bf16.vlgmr.msra.gmra.mrb[0].mxu0 %vm89_vm0, %v59_v10 }
   0xd   :  { %2813 = vmatprep.mubr.msk.bf16.mxu0 %vm89_vm0, %v60_v11 }
  0x14   :  { %2814 = vmatmul.mubr.msk.bf16.gmra.mrb[4].mxu0 %vm89_vm0, %v61_v16 }
  0x15   :  { %2817 = vmatprep.mubr.msk.bf16.mxu0 %vm89_vm0, %v62_v17 }
  0x16   :  { %18 = vsyncpa [#allocation4], 0  ;;  %v54_v20 = vld [vmem:[%s4572_s0 + $0x60] sm:$0xff]  ;;  %v55_v21 = vld [vmem:[%s4572_s0 + $0x68] sm:$0xff]  ;;  %v63_v22 = vpack.c.bf16 %v53_v19, %v52_v18  ;;  %vm2463_vm8 = vcmask 130112   ;;  %vm2470_vm9 = vcmask 195712  }
  0x17   :  { %v64_v23 = vpack.c.bf16 %v55_v21, %v54_v20  ;;  %v56_v24 = vld [vmem:[%s4572_s0 + $0x70] sm:$0xff]  ;;  %v57_v25 = vld [vmem:[%s4572_s0 + $0x78] sm:$0xff]  ;;  %v3138_v27 = vld [vmem:[%s4577_s5 + $0x40] sm:$0xff]   ;;  %vm2477_vm10 = vcmask 261312   ;;  %vm2484_vm11 = vcmask 326912   ;;  %vm2491_vm12 = vcmask 392512  }
  0x18   :  { %v65_v26 = vpack.c.bf16 %v57_v25, %v56_v24  ;;  %2905 = vmatprep.subr.bf16.mxu1 %v3138_v27  ;;  %v3139_v28 = vld [vmem:[%s4577_s5 + $0x10] sm:$0xff]   ;;  %v3140_v29 = vld [vmem:[%s4577_s5 + $0x48] sm:$0xff]   ;;  %v3141_v30 = vld [vmem:[%s4577_s5 + $0x18] sm:$0xff]   ;;  %vm2498_vm13 = vcmask 458112   ;;  %vm2505_vm14 = vcmask 523712   ;;  %vm2546_vm15 = vcmask 1041409  }
  0x19   :  { %2906 = vmatpush3.bf16.msra.mxu1 %v3138_v27  ;;  %2825 = vmatprep.subr.bf16.mxu0 %v3139_v28  ;;  %v3326_v31 = vld [vmem:[%s4577_s5 + $0x50] sm:$0xff]   ;;  %v3332_v32 = vld [vmem:[%s4577_s5] sm:$0xff]  }
  0x1a   :  { %2907 = vmatprep.subr.bf16.mxu1 %v3140_v29  ;;  %2826 = vmatpush3.bf16.msra.mxu0 %v3139_v28  ;;  %v3338_v33 = vld [vmem:[%s4574_s2] ss:$0 sm:$0xff] }
  0x1b   :  { %2827 = vmatprep.subr.bf16.mxu0 %v3141_v30 }
  0x1c   :  { %2818 = vmatmul.mubr.msk.bf16.gmra.mrb[8].mxu0 %vm89_vm0, %v63_v22 }
  0x1d   :  { %2821 = vmatprep.mubr.msk.bf16.mxu0 %vm89_vm0, %v64_v23  ;;  %2908 = vmatpush3.bf16.msra.mxu1 %v3140_v29 }
  0x1e   :  { %2828 = vmatpush3.bf16.msra.mxu0 %v3141_v30  ;;  %2925 = vmatprep.subr.bf16.mxu1 %v3326_v31 }
  0x1f   :  { %2845 = vmatprep.subr.bf16.mxu0 %v3332_v32 }
  0x24   :  { %2822 = vmatmul.mubr.msk.bf16.gmra.mrb[12].mxu0 %vm89_vm0, %v65_v26 }
  0xdf   :  { %v2811_v34 = vpop.f32.mrb[0].mxu0 }
  0xe0   :  { %v148_v35 = vpop.f32.mrb[1].mxu0  ;;  %v3341_v36 = vadd.f32 %v2811_v34, %v3338_v33 }
  0xe1   :  { %v3344_v37 = vadd.f32 %v3338_v33, %v148_v35  ;;  %v2812_v38 = vpop.f32.mrb[2].mxu0 }
  0xe2   :  { %v151_v39 = vpop.f32.mrb[3].mxu0  ;;  %v3349_v41 = vadd.f32 %v2812_v38, %v3338_v33  ;;  %v254_v43 = vmul.f32 %v3341_v36, %v3341_v36  ;;  %v216_v48 = vsel %vm89_vm0, %v3341_v36, 0.0 }
  0xe3   :  { %v252_v40 = vmul.f32 %v3344_v37, %v3344_v37  ;;  %v3352_v42 = vadd.f32 %v3338_v33, %v151_v39  ;;  %v213_v44 = vsel %vm89_vm0, %v3344_v37, 0.0 }
  0xe4   :  { %v255_v50 = vmul.f32 %v3349_v41, %v3349_v41  ;;  %v271_v56 = vsel %vm89_vm0, %v254_v43, 0.0  ;;  %v218_v57 = vsel %vm89_vm0, %v3349_v41, 0.0 }
  0xe5   :  { %v214_v45 = vsel %vm89_vm0, %v3352_v42, 0.0  ;;  %v253_v46 = vmul.f32 %v3352_v42, %v3352_v42  ;;  %v268_v49 = vsel %vm89_vm0, %v252_v40, 0.0 }
  0xe6   :  { %v215_v47 = vadd.f32 %v214_v45, %v213_v44  ;;  %v273_v0 = vsel %vm89_vm0, %v255_v50, 0.0 }
  0xe7   :  { %v269_v51 = vsel %vm89_vm0, %v253_v46, 0.0  ;;  %v2815_v52 = vpop.f32.mrb[4].mxu0 }
  0xe8   :  { %v217_v53 = vadd.f32 %v216_v48, %v215_v47  ;;  %v270_v54 = vadd.f32 %v269_v51, %v268_v49  ;;  %v164_v55 = vpop.f32.mrb[5].mxu0  ;;  %v3375_v61 = vadd.f32 %v2815_v52, %v3338_v33 }
  0xe9   :  { %v3372_v58 = vadd.f32 %v3338_v33, %v164_v55  ;;  %v2816_v59 = vpop.f32.mrb[6].mxu0 }
  0xea   :  { %v272_v60 = vadd.f32 %v271_v56, %v270_v54  ;;  %v219_v62 = vadd.f32 %v218_v57, %v217_v53  ;;  %v167_v63 = vpop.f32.mrb[7].mxu0  ;;  %v3386_v6 = vadd.f32 %v2816_v59, %v3338_v33  ;;  %v258_v9 = vmul.f32 %v3375_v61, %v3375_v61 }
  0xeb   :  { %v220_v1 = vsel %vm89_vm0, %v3372_v58, 0.0  ;;  %v256_v2 = vmul.f32 %v3372_v58, %v3372_v58  ;;  %v3383_v3 = vadd.f32 %v3338_v33, %v167_v63  ;;  %v224_v13 = vsel %vm89_vm0, %v3375_v61, 0.0 }
  0xec   :  { %v221_v4 = vadd.f32 %v220_v1, %v219_v62  ;;  %v274_v5 = vadd.f32 %v273_v0, %v272_v60  ;;  %v259_v15 = vmul.f32 %v3386_v6, %v3386_v6  ;;  %v226_v19 = vsel %vm89_vm0, %v3386_v6, 0.0 }
  0xed   :  { %v275_v7 = vsel %vm89_vm0, %v256_v2, 0.0  ;;  %v222_v8 = vsel %vm89_vm0, %v3383_v3, 0.0  ;;  %v257_v12 = vmul.f32 %v3383_v3, %v3383_v3  ;;  %v279_v23 = vsel %vm89_vm0, %v258_v9, 0.0 }
  0xee   :  { %v276_v10 = vadd.f32 %v275_v7, %v274_v5  ;;  %v223_v11 = vadd.f32 %v222_v8, %v221_v4  ;;  %v281_v34 = vsel %vm89_vm0, %v259_v15, 0.0 }
  0xef   :  { %v2819_v14 = vpop.f32.mrb[8].mxu0  ;;  %v277_v17 = vsel %vm89_vm0, %v257_v12, 0.0 }
  0xf0   :  { %v225_v16 = vadd.f32 %v224_v13, %v223_v11  ;;  %v180_v18 = vpop.f32.mrb[9].mxu0  ;;  %v278_v20 = vadd.f32 %v277_v17, %v276_v10  ;;  %v3407_v24 = vadd.f32 %v2819_v14, %v3338_v33 }
  0xf1   :  { %v3403_v21 = vadd.f32 %v3338_v33, %v180_v18  ;;  %v2820_v22 = vpop.f32.mrb[10].mxu0 }
  0xf2   :  { %v227_v25 = vadd.f32 %v226_v19, %v225_v16  ;;  %v183_v26 = vpop.f32.mrb[11].mxu0  ;;  %v280_v27 = vadd.f32 %v279_v23, %v278_v20  ;;  %v3418_v38 = vadd.f32 %v2820_v22, %v3338_v33  ;;  %v262_v45 = vmul.f32 %v3407_v24, %v3407_v24 }
  0xf3   :  { %v228_v28 = vsel %vm89_vm0, %v3403_v21, 0.0  ;;  %v260_v29 = vmul.f32 %v3403_v21, %v3403_v21  ;;  %v3414_v30 = vadd.f32 %v3338_v33, %v183_v26  ;;  %v232_v47 = vsel %vm89_vm0, %v3407_v24, 0.0 }
  0xf4   :  { %v229_v35 = vadd.f32 %v228_v28, %v227_v25  ;;  %v282_v39 = vadd.f32 %v281_v34, %v280_v27  ;;  %v263_v51 = vmul.f32 %v3418_v38, %v3418_v38  ;;  %v234_v54 = vsel %vm89_vm0, %v3418_v38, 0.0 }
  0xf5   :  { %v283_v40 = vsel %vm89_vm0, %v260_v29, 0.0  ;;  %v230_v43 = vsel %vm89_vm0, %v3414_v30, 0.0  ;;  %v261_v44 = vmul.f32 %v3414_v30, %v3414_v30  ;;  %v287_v59 = vsel %vm89_vm0, %v262_v45, 0.0 }
  0xf6   :  { %v231_v46 = vadd.f32 %v230_v43, %v229_v35  ;;  %v284_v48 = vadd.f32 %v283_v40, %v282_v39  ;;  %v289_v5 = vsel %vm89_vm0, %v263_v51, 0.0 }
  0xf7   :  { %v285_v49 = vsel %vm89_vm0, %v261_v44, 0.0  ;;  %v2823_v50 = vpop.f32.mrb[12].mxu0 }
  0xf8   :  { %v233_v52 = vadd.f32 %v232_v47, %v231_v46  ;;  %v196_v53 = vpop.f32.mrb[13].mxu0  ;;  %v286_v55 = vadd.f32 %v285_v49, %v284_v48  ;;  %v3439_v60 = vadd.f32 %v2823_v50, %v3338_v33 }
  0xf9   :  { %v3435_v56 = vadd.f32 %v3338_v33, %v196_v53  ;;  %v2824_v57 = vpop.f32.mrb[14].mxu0 }
  0xfa   :  { %v235_v62 = vadd.f32 %v234_v54, %v233_v52  ;;  %v199_v63 = vpop.f32.mrb[15].mxu0  ;;  %v288_v0 = vadd.f32 %v287_v59, %v286_v55  ;;  %v3448_v8 = vadd.f32 %v2824_v57, %v3338_v33  ;;  %v266_v13 = vmul.f32 %v3439_v60, %v3439_v60 }
  0xfb   :  { %v236_v1 = vsel %vm89_vm0, %v3435_v56, 0.0  ;;  %v264_v2 = vmul.f32 %v3435_v56, %v3435_v56  ;;  %v200_v4 = vadd.f32 %v3338_v33, %v199_v63  ;;  %v240_v15 = vsel %vm89_vm0, %v3439_v60, 0.0 }
  0xfc   :  { %v237_v7 = vadd.f32 %v236_v1, %v235_v62  ;;  %v290_v9 = vadd.f32 %v289_v5, %v288_v0  ;;  %v267_v33 = vmul.f32 %v3448_v8, %v3448_v8  ;;  %v242_v19 = vsel %vm89_vm0, %v3448_v8, 0.0 }
  0xfd   :  { %v291_v10 = vsel %vm89_vm0, %v264_v2, 0.0  ;;  %v238_v11 = vsel %vm89_vm0, %v200_v4, 0.0  ;;  %v265_v12 = vmul.f32 %v200_v4, %v200_v4  ;;  %v295_v22 = vsel %vm89_vm0, %v266_v13, 0.0  ;;  %v3515_v13 = vld [vmem:[%s4576_s4] ss:$0 sm:$0xff] }
  0xfe   :  { %v239_v14 = vadd.f32 %v238_v11, %v237_v7  ;;  %v292_v16 = vadd.f32 %v291_v10, %v290_v9  ;;  %v297_v26 = vsel %vm89_vm0, %v267_v33, 0.0  ;;  %v4584_v2 = vlaneseq  ;;  %v3506_v7 = vld [vmem:[%s4575_s3] ss:$0 sm:$0xff] }
  0xff   :  { %v293_v17 = vsel %vm89_vm0, %v265_v12, 0.0 }
 0x100   :  { %v241_v18 = vadd.f32 %v240_v15, %v239_v14  ;;  %v294_v20 = vadd.f32 %v293_v17, %v292_v16 }
 0x102   :  { %v243_v23 = vadd.f32 %v242_v19, %v241_v18  ;;  %v296_v25 = vadd.f32 %v295_v22, %v294_v20 }
 0x104   :  { %v244_v27 = vrot.slane %v243_v23, 4  ;;  %v298_v28 = vadd.f32 %v297_v26, %v296_v25 }
 0x106   :  { %v245_v29 = vadd.f32 %v244_v27, %v243_v23  ;;  %v299_v34 = vrot.slane %v298_v28, 4 }
 0x108   :  { %v246_v35 = vrot.slane %v245_v29, 2  ;;  %v300_v39 = vadd.f32 %v299_v34, %v298_v28 }
 0x10a   :  { %v247_v40 = vadd.f32 %v246_v35, %v245_v29  ;;  %v301_v43 = vrot.slane %v300_v39, 2 }
 0x10c   :  { %v248_v44 = vrot.slane %v247_v40, 1  ;;  %v302_v45 = vadd.f32 %v301_v43, %v300_v39 }
 0x10e   :  { %v249_v46 = vadd.f32 %v248_v44, %v247_v40  ;;  %v303_v47 = vrot.slane %v302_v45, 1 }
 0x110   :  { %v3463_v48 = vmul.f32 0.0078125, %v249_v46  ;;  %v304_v49 = vadd.f32 %v303_v47, %v302_v45 }
 0x112   :  { %v306_v50 = vmul.f32 %v3463_v48, %v3463_v48  ;;  %v322_v51 = vsub.f32 %v200_v4, %v3463_v48  ;;  %v309_v52 = vsub.f32 %v3344_v37, %v3463_v48  ;;  %v310_v53 = vsub.f32 %v3352_v42, %v3463_v48 }
 0x113   :  { %v305_v54 = vmul.f32 0.0078125, %v304_v49  ;;  %v311_v55 = vsub.f32 %v3341_v36, %v3463_v48  ;;  %v312_v57 = vsub.f32 %v3349_v41, %v3463_v48  ;;  %v313_v59 = vsub.f32 %v3372_v58, %v3463_v48 }
 0x114   :  { %v314_v62 = vsub.f32 %v3383_v3, %v3463_v48  ;;  %v316_v63 = vsub.f32 %v3386_v6, %v3463_v48  ;;  %v315_v37 = vsub.f32 %v3375_v61, %v3463_v48  ;;  %v317_v42 = vsub.f32 %v3403_v21, %v3463_v48 }
 0x115   :  { %v307_v0 = vsub.f32 %v305_v54, %v306_v50  ;;  %v318_v36 = vsub.f32 %v3414_v30, %v3463_v48  ;;  %v324_v41 = vsub.f32 %v3448_v8, %v3463_v48  ;;  %v319_v58 = vsub.f32 %v3407_v24, %v3463_v48  ;;  %v3618_v24 = vld [vmem:[%s4577_s5 + $0x60] sm:$0xff]  }
 0x116   :  { %v320_v3 = vsub.f32 %v3418_v38, %v3463_v48  ;;  %v321_v6 = vsub.f32 %v3435_v56, %v3463_v48  ;;  %v323_v61 = vsub.f32 %v3439_v60, %v3463_v48  ;;  %v3499_v4 = vshrl.u32 %v4584_v2, 7 }
 0x117   :  { %v308_v21 = vmax.f32 %v307_v0, 0.0 }
 0x118   :  { %vm482_vm1 = vcmp.lt.s32.totalorder %v3499_v4, 3  ;;  %vm1346_vm2 = vcmp.lt.s32.totalorder %v3499_v4, 7  ;;  %vm437_vm3 = vcmp.lt.s32.totalorder %v3499_v4, 4  ;;  %vm1541_vm4 = vcmp.lt.s32.totalorder %v3499_v4, 6 }
 0x119   :  { %v325_v1 = vadd.f32 1e-05, %v308_v21  ;;  %vm794_vm5 = vcmp.lt.s32.totalorder %v3499_v4, 2  ;;  %vm1736_vm6 = vcmp.lt.s32.totalorder %v3499_v4, 5  ;;  %vm989_vm7 = vcmp.lt.s32.totalorder %v3499_v4, 1 }
 0x11b   :  { %3156 = vrsqrt.f32 %v325_v1 }
 0x125   :  { %v3501_v5 = vpop.eup %3156 }
 0x126   :  { %v340_v9 = vmul.f32 %v3501_v5, %v322_v51  ;;  %v327_v10 = vmul.f32 %v3501_v5, %v309_v52  ;;  %v328_v11 = vmul.f32 %v3501_v5, %v310_v53  ;;  %v329_v12 = vmul.f32 %v3501_v5, %v311_v55 }
 0x127   :  { %v330_v14 = vmul.f32 %v3501_v5, %v312_v57  ;;  %v331_v15 = vmul.f32 %v3501_v5, %v313_v59  ;;  %v332_v16 = vmul.f32 %v3501_v5, %v314_v62  ;;  %v334_v17 = vmul.f32 %v3501_v5, %v316_v63 }
 0x128   :  { %v362_v33 = vmul.f32 %v3506_v7, %v340_v9  ;;  %v349_v18 = vmul.f32 %v3506_v7, %v327_v10  ;;  %v350_v19 = vmul.f32 %v3506_v7, %v328_v11  ;;  %v351_v20 = vmul.f32 %v3506_v7, %v329_v12 }
 0x129   :  { %v352_v22 = vmul.f32 %v3506_v7, %v330_v14  ;;  %v353_v23 = vmul.f32 %v3506_v7, %v331_v15  ;;  %v354_v25 = vmul.f32 %v3506_v7, %v332_v16  ;;  %v356_v26 = vmul.f32 %v3506_v7, %v334_v17  ;;  %v3143_v14 = vld [vmem:[%s4577_s5 + $0x58] sm:$0xff]  }
 0x12a   :  { %v384_v27 = vadd.f32 %v3515_v13, %v362_v33  ;;  %v371_v28 = vadd.f32 %v3515_v13, %v349_v18  ;;  %v372_v29 = vadd.f32 %v3515_v13, %v350_v19  ;;  %v373_v34 = vadd.f32 %v3515_v13, %v351_v20 }
 0x12b   :  { %v374_v35 = vadd.f32 %v3515_v13, %v352_v22  ;;  %v375_v39 = vadd.f32 %v3515_v13, %v353_v23  ;;  %v376_v40 = vadd.f32 %v3515_v13, %v354_v25  ;;  %v378_v43 = vadd.f32 %v3515_v13, %v356_v26 }
 0x12c   :  { %v400_v44 = vmul.f32 0.2, %v384_v27  ;;  %v387_v45 = vmul.f32 0.2, %v371_v28  ;;  %v388_v46 = vmul.f32 0.2, %v372_v29  ;;  %v333_v47 = vmul.f32 %v3501_v5, %v315_v37 }
 0x12d   :  { %v389_v49 = vmul.f32 0.2, %v373_v34  ;;  %v390_v50 = vmul.f32 0.2, %v374_v35  ;;  %v391_v51 = vmul.f32 0.2, %v375_v39  ;;  %v335_v52 = vmul.f32 %v3501_v5, %v317_v42 }
 0x12e   :  { %v3540_v53 = vmax.f32 %v384_v27, %v400_v44  ;;  %v3542_v54 = vmax.f32 %v371_v28, %v387_v45  ;;  %v3544_v55 = vmax.f32 %v372_v29, %v388_v46  ;;  %v392_v57 = vmul.f32 0.2, %v376_v40 }
 0x12f   :  { %v3546_v59 = vmax.f32 %v373_v34, %v389_v49  ;;  %v3548_v62 = vmax.f32 %v374_v35, %v390_v50  ;;  %v3550_v63 = vmax.f32 %v375_v39, %v391_v51  ;;  %v394_v0 = vmul.f32 0.2, %v378_v43 }
 0x130   :  { %v1168_v37 = vpack.c.bf16 %v3544_v55, %v3542_v54  ;;  %v3554_v21 = vmax.f32 %v376_v40, %v392_v57  ;;  %v466_v42 = vrot.slane %v3542_v54, 5  ;;  %v468_v1 = vrot.slane %v3544_v55, 5 }
 0x131   :  { %v1169_v9 = vpack.c.bf16 %v3548_v62, %v3546_v59  ;;  %v3560_v10 = vmax.f32 %v378_v43, %v394_v0  ;;  %v470_v11 = vrot.slane %v3546_v59, 5  ;;  %v472_v12 = vrot.slane %v3548_v62, 5 }
 0x132   :  { %2909 = vmatprep.mubr.msk.bf16.mxu1 %vm89_vm0, %v1168_v37  ;;  %v1170_v15 = vpack.c.bf16 %v3554_v21, %v3550_v63  ;;  %v495_v16 = vsel %vm482_vm1, %v466_v42, %v468_v1  ;;  %v474_v17 = vrot.slane %v3550_v63, 5  ;;  %v476_v33 = vrot.slane %v3554_v21, 5  ;;  %v3646_v37 = vld [vmem:[%s4577_s5 + $0x20] sm:$0xff]  }
 0x133   :  { %2910 = vmatmul.mubr.msk.bf16.vlgmr.msra.gmra.mrb[0].mxu1 %vm89_vm0, %v1169_v9  ;;  %v480_v18 = vrot.slane %v3560_v10, 5  ;;  %v493_v19 = vsel %vm482_vm1, %v468_v1, %v470_v11  ;;  %v491_v20 = vsel %vm482_vm1, %v470_v11, %v472_v12  ;;  %v355_v22 = vmul.f32 %v3506_v7, %v333_v47 }
 0x134   :  { %2926 = vmatpush3.bf16.msra.mxu1 %v3326_v31  ;;  %2913 = vmatprep.mubr.msk.bf16.mxu1 %vm89_vm0, %v1170_v15  ;;  %v500_v23 = vpack.c.bf16 %v491_v20, %v493_v19  ;;  %v487_v25 = vsel %vm482_vm1, %v474_v17, %v476_v33  ;;  %v489_v26 = vsel %vm482_vm1, %v472_v12, %v474_v17 }
 0x135   :  { %v497_v27 = vsel %vm482_vm1, %v480_v18, %v466_v42  ;;  %v501_v28 = vpack.c.bf16 %v487_v25, %v489_v26  ;;  %v377_v29 = vadd.f32 %v3515_v13, %v355_v22  ;;  %v336_v31 = vmul.f32 %v3501_v5, %v318_v36  ;;  %2927 = vmatprep.subr.bf16.mxu1 %v3143_v14  ;;  %v3145_v36 = vld [vmem:[%s4577_s5 + $0x8] sm:$0xff]  }
 0x136   :  { %v499_v34 = vpack.c.bf16 %v495_v16, %v497_v27  ;;  %v357_v35 = vmul.f32 %v3506_v7, %v335_v52  ;;  %v342_v39 = vmul.f32 %v3501_v5, %v324_v41  ;;  %v337_v40 = vmul.f32 %v3501_v5, %v319_v58 }
 0x137   :  { %v393_v43 = vmul.f32 0.2, %v377_v29  ;;  %v358_v44 = vmul.f32 %v3506_v7, %v336_v31  ;;  %v338_v30 = vmul.f32 %v3501_v5, %v320_v3  ;;  %v339_v8 = vmul.f32 %v3501_v5, %v321_v6 }
 0x138   :  { %2829 = vmatprep.mubr.msk.bf16.mxu0 %vm89_vm0, %v499_v34  ;;  %v379_v38 = vadd.f32 %v3515_v13, %v357_v35  ;;  %v364_v41 = vmul.f32 %v3506_v7, %v342_v39  ;;  %v359_v58 = vmul.f32 %v3506_v7, %v337_v40  ;;  %2928 = vmatpush3.bf16.msra.mxu1 %v3143_v14  ;;  %v477_v27 = vrot.slane %v3540_v53, 5 }
 0x139   :  { %2830 = vmatmul.mubr.msk.bf16.vlgmr.msra.gmra.mrb[16].mxu0 %vm89_vm0, %v500_v23  ;;  %v3625_v56 = vmax.f32 %v377_v29, %v393_v43  ;;  %v380_v3 = vadd.f32 %v3515_v13, %v358_v44  ;;  %v360_v6 = vmul.f32 %v3506_v7, %v338_v30  ;;  %v361_v45 = vmul.f32 %v3506_v7, %v339_v8 }
 0x13a   :  { %2833 = vmatprep.mubr.msk.bf16.mxu0 %vm89_vm0, %v501_v28  ;;  %v395_v46 = vmul.f32 0.2, %v379_v38  ;;  %v386_v47 = vadd.f32 %v3515_v13, %v364_v41  ;;  %v381_v49 = vadd.f32 %v3515_v13, %v359_v58  ;;  %v341_v50 = vmul.f32 %v3501_v5, %v323_v61  ;;  %2846 = vmatpush3.bf16.msra.mxu0 %v3332_v32 }
 0x13b   :  { %v1171_v51 = vpack.c.bf16 %v3560_v10, %v3625_v56  ;;  %v396_v52 = vmul.f32 0.2, %v380_v3  ;;  %v478_v57 = vrot.slane %v3625_v56, 5  ;;  %v382_v0 = vadd.f32 %v3515_v13, %v360_v6  ;;  %2847 = vmatprep.subr.bf16.mxu0 %v3145_v36  ;;  %2945 = vmatprep.subr.bf16.mxu1 %v3618_v24 }
 0x13c   :  { %v3648_v60 = vmax.f32 %v379_v38, %v395_v46  ;;  %v402_v48 = vmul.f32 0.2, %v386_v47  ;;  %v397_v32 = vmul.f32 0.2, %v381_v49  ;;  %v383_v61 = vadd.f32 %v3515_v13, %v361_v45 }
 0x13d   :  { %2914 = vmatmul.mubr.msk.bf16.gmra.mrb[4].mxu1 %vm89_vm0, %v1171_v51  ;;  %v3652_v5 = vmax.f32 %v380_v3, %v396_v52  ;;  %v483_v42 = vsel %vm482_vm1, %v478_v57, %v480_v18  ;;  %v485_v1 = vsel %vm482_vm1, %v476_v33, %v478_v57  ;;  %v398_v9 = vmul.f32 0.2, %v382_v0 }
 0x13e   :  { %v502_v11 = vpack.c.bf16 %v483_v42, %v485_v1  ;;  %v3658_v12 = vmax.f32 %v386_v47, %v402_v48  ;;  %v467_v14 = vrot.slane %v3648_v60, 5  ;;  %v3661_v15 = vmax.f32 %v381_v49, %v397_v32  ;;  %2848 = vmatpush3.bf16.msra.mxu0 %v3145_v36 }
 0x13f   :  { %v1172_v16 = vpack.c.bf16 %v3652_v5, %v3648_v60  ;;  %v469_v17 = vrot.slane %v3652_v5, 5  ;;  %v3666_v19 = vmax.f32 %v382_v0, %v398_v9  ;;  %v399_v18 = vmul.f32 0.2, %v383_v61  ;;  %2865 = vmatprep.subr.bf16.mxu0 %v3646_v37 }
 0x140   :  { %v481_v33 = vrot.slane %v3658_v12, 5  ;;  %v471_v20 = vrot.slane %v3661_v15, 5  ;;  %v363_v22 = vmul.f32 %v3506_v7, %v341_v50  ;;  %v1330_v7 = vrot.slane %v3542_v54, 1 }
 0x141   :  { %2917 = vmatprep.mubr.msk.bf16.mxu1 %vm89_vm0, %v1172_v16  ;;  %2834 = vmatmul.mubr.msk.bf16.gmra.mrb[20].mxu0 %vm89_vm0, %v502_v11  ;;  %v496_v23 = vsel %vm482_vm1, %v467_v14, %v469_v17  ;;  %v3676_v25 = vmax.f32 %v383_v61, %v399_v18  ;;  %v473_v26 = vrot.slane %v3666_v19, 5  ;;  %v1332_v31 = vrot.slane %v3544_v55, 1 }
 0x142   :  { %v498_v28 = vsel %vm482_vm1, %v481_v33, %v467_v14  ;;  %v385_v29 = vadd.f32 %v3515_v13, %v363_v22  ;;  %v1173_v35 = vpack.c.bf16 %v3666_v19, %v3661_v15  ;;  %v494_v39 = vsel %vm482_vm1, %v469_v17, %v471_v20 }
 0x143   :  { %v503_v34 = vpack.c.bf16 %v496_v23, %v498_v28  ;;  %v475_v40 = vrot.slane %v3676_v25, 5  ;;  %v1174_v43 = vpack.c.bf16 %v3540_v53, %v3676_v25  ;;  %v492_v44 = vsel %vm482_vm1, %v471_v20, %v473_v26 }
 0x144   :  { %v401_v13 = vmul.f32 0.2, %v385_v29  ;;  %v1334_v30 = vrot.slane %v3546_v59, 1  ;;  %v504_v41 = vpack.c.bf16 %v492_v44, %v494_v39  ;;  %v1359_v6 = vsel %vm1346_vm2, %v1330_v7, %v1332_v31 }
 0x145   :  { %2837 = vmatprep.mubr.msk.bf16.mxu0 %vm89_vm0, %v503_v34  ;;  %2918 = vmatmul.mubr.msk.bf16.gmra.mrb[8].mxu1 %vm89_vm0, %v1173_v35  ;;  %v488_v8 = vsel %vm482_vm1, %v475_v40, %v477_v27  ;;  %v490_v36 = vsel %vm482_vm1, %v473_v26, %v475_v40  ;;  %v419_v46 = vrot.slane %v3542_v54, 4  ;;  %v421_v47 = vrot.slane %v3544_v55, 4  ;;  %v3147_v34 = vld [vmem:[%s4577_s5 + $0x68] sm:$0xff]  }
 0x146   :  { %2921 = vmatprep.mubr.msk.bf16.mxu1 %vm89_vm0, %v1174_v43  ;;  %v3703_v38 = vmax.f32 %v385_v29, %v401_v13  ;;  %v505_v58 = vpack.c.bf16 %v488_v8, %v490_v36  ;;  %v1357_v3 = vsel %vm1346_vm2, %v1332_v31, %v1334_v30  ;;  %v423_v49 = vrot.slane %v3546_v59, 4  ;;  %v3791_v36 = vld [vmem:[%s4577_s5 + $0x70] sm:$0xff]  }
 0x147   :  { %v433_v50 = vrot.slane %v3560_v10, 4  ;;  %v1336_v51 = vrot.slane %v3548_v62, 1  ;;  %v1363_v57 = vpack.c.bf16 %v1357_v3, %v1359_v6  ;;  %v1338_v0 = vrot.slane %v3550_v63, 1  ;;  %v3149_v6 = vld [vmem:[%s4577_s5 + $0x28] sm:$0xff]  }
 0x148   :  { %v479_v45 = vrot.slane %v3703_v38, 5  ;;  %v1175_v52 = vpack.c.bf16 %v3658_v12, %v3703_v38  ;;  %v425_v48 = vrot.slane %v3548_v62, 4  ;;  %v1340_v42 = vrot.slane %v3554_v21, 1 }
 0x149   :  { %2838 = vmatmul.mubr.msk.bf16.gmra.mrb[24].mxu0 %vm89_vm0, %v504_v41  ;;  %v427_v1 = vrot.slane %v3550_v63, 4  ;;  %v3733_v9 = vsel %vm437_vm3, %v419_v46, %v421_v47  ;;  %v3739_v11 = vsel %vm437_vm3, %v433_v50, %v419_v46  ;;  %v1342_v14 = vrot.slane %v3625_v56, 1 }
 0x14a   :  { %2841 = vmatprep.mubr.msk.bf16.mxu0 %vm89_vm0, %v505_v58  ;;  %v484_v32 = vsel %vm482_vm1, %v479_v45, %v481_v33  ;;  %v486_v61 = vsel %vm482_vm1, %v477_v27, %v479_v45  ;;  %v3744_v16 = vsel %vm437_vm3, %v423_v49, %v425_v48  ;;  %v1355_v20 = vsel %vm1346_vm2, %v1334_v30, %v1336_v51 }
 0x14b   :  { %v3749_v17 = vsel %vm437_vm3, %v425_v48, %v427_v1  ;;  %v506_v18 = vpack.c.bf16 %v484_v32, %v486_v61  ;;  %v454_v22 = vpack.c.bf16 %v3733_v9, %v3739_v11  ;;  %v1353_v23 = vsel %vm1346_vm2, %v1336_v51, %v1338_v0 }
 0x14c   :  { %v1916_v33 = vpack.c.bf16 %v3749_v17, %v3744_v16  ;;  %v1349_v26 = vsel %vm1346_vm2, %v1340_v42, %v1342_v14  ;;  %v1351_v27 = vsel %vm1346_vm2, %v1338_v0, %v1340_v42  ;;  %v429_v28 = vrot.slane %v3554_v21, 4 }
 0x14d   :  { %2922 = vmatmul.mubr.msk.bf16.gmra.mrb[12].mxu1 %vm89_vm0, %v1175_v52  ;;  %v1364_v29 = vpack.c.bf16 %v1353_v23, %v1355_v20  ;;  %v1344_v31 = vrot.slane %v3560_v10, 1  ;;  %v3772_v35 = vsel %vm437_vm3, %v421_v47, %v423_v49  ;;  %v1365_v39 = vpack.c.bf16 %v1349_v26, %v1351_v27 }
 0x14e   :  { %2929 = vmatprep.mubr.msk.bf16.mxu1 %vm89_vm0, %v1363_v57  ;;  %v1333_v40 = vrot.slane %v3652_v5, 1  ;;  %v1335_v43 = vrot.slane %v3661_v15, 1  ;;  %v3779_v44 = vsel %vm437_vm3, %v427_v1, %v429_v28  ;;  %v1331_v13 = vrot.slane %v3648_v60, 1 }
 0x14f   :  { %v455_v30 = vpack.c.bf16 %v3744_v16, %v3772_v35  ;;  %v1347_v8 = vsel %vm1346_vm2, %v1342_v14, %v1344_v31  ;;  %v456_v41 = vpack.c.bf16 %v3779_v44, %v3749_v17  ;;  %v431_v3 = vrot.slane %v3625_v56, 4 }
 0x150   :  { %v1358_v58 = vsel %vm1346_vm2, %v1333_v40, %v1335_v43  ;;  %v1360_v45 = vsel %vm1346_vm2, %v1331_v13, %v1333_v40  ;;  %v420_v46 = vrot.slane %v3648_v60, 4  ;;  %v434_v47 = vrot.slane %v3658_v12, 4 }
 0x151   :  { %2842 = vmatmul.mubr.msk.bf16.gmra.mrb[28].mxu0 %vm89_vm0, %v506_v18  ;;  %v1337_v51 = vrot.slane %v3666_v19, 1  ;;  %v1367_v52 = vpack.c.bf16 %v1358_v58, %v1360_v45  ;;  %v3821_v57 = vsel %vm437_vm3, %v431_v3, %v433_v50  ;;  %v3825_v0 = vsel %vm437_vm3, %v429_v28, %v431_v3 }
 0x152   :  { %2849 = vmatprep.mubr.msk.bf16.mxu0 %vm89_vm0, %v454_v22  ;;  %v1339_v48 = vrot.slane %v3676_v25, 1  ;;  %v3842_v50 = vsel %vm437_vm3, %v434_v47, %v420_v46  ;;  %v1341_v61 = vrot.slane %v3540_v53, 1  ;;  %v1343_v42 = vrot.slane %v3703_v38, 1 }
 0x153   :  { %v457_v1 = vpack.c.bf16 %v3821_v57, %v3825_v0  ;;  %v1356_v14 = vsel %vm1346_vm2, %v1335_v43, %v1337_v51  ;;  %v424_v22 = vrot.slane %v3661_v15, 4  ;;  %v426_v23 = vrot.slane %v3666_v19, 4 }
 0x154   :  { %v1354_v20 = vsel %vm1346_vm2, %v1337_v51, %v1339_v48  ;;  %v1350_v26 = vsel %vm1346_vm2, %v1341_v61, %v1343_v42  ;;  %v1352_v27 = vsel %vm1346_vm2, %v1339_v48, %v1341_v61  ;;  %v428_v28 = vrot.slane %v3676_v25, 4 }
 0x155   :  { %2930 = vmatmul.mubr.msk.bf16.vlgmr.msra.gmra.mrb[0].mxu1 %vm89_vm0, %v1364_v29  ;;  %v430_v29 = vrot.slane %v3540_v53, 4  ;;  %v3869_v40 = vsel %vm437_vm3, %v424_v22, %v426_v23  ;;  %v1529_v58 = vrot.slane %v3546_v59, 2  ;;  %v780_v48 = vrot.slane %v3544_v55, 6 }
 0x156   :  { %2946 = vmatpush3.bf16.msra.mxu1 %v3618_v24  ;;  %2933 = vmatprep.mubr.msk.bf16.mxu1 %vm89_vm0, %v1365_v39  ;;  %v1361_v24 = vsel %vm1346_vm2, %v1344_v31, %v1330_v7  ;;  %v422_v7 = vrot.slane %v3652_v5, 4  ;;  %v1368_v31 = vpack.c.bf16 %v1354_v20, %v1356_v14  ;;  %v1369_v39 = vpack.c.bf16 %v1350_v26, %v1352_v27 }
 0x157   :  { %2947 = vmatprep.subr.bf16.mxu1 %v3147_v34  ;;  %v1366_v49 = vpack.c.bf16 %v1361_v24, %v1347_v8  ;;  %v3879_v8 = vsel %vm437_vm3, %v428_v28, %v430_v29  ;;  %v1527_v24 = vrot.slane %v3544_v55, 2  ;;  %v792_v61 = vrot.slane %v3560_v10, 6 }
 0x158   :  { %v3836_v32 = vsel %vm437_vm3, %v420_v46, %v422_v7  ;;  %v3873_v43 = vsel %vm437_vm3, %v422_v7, %v424_v22  ;;  %v432_v7 = vrot.slane %v3703_v38, 4  ;;  %v1533_v20 = vrot.slane %v3550_v63, 2 }
 0x159   :  { %2850 = vmatmul.mubr.msk.bf16.vlgmr.msra.gmra.mrb[16].mxu0 %vm89_vm0, %v455_v30  ;;  %v458_v18 = vpack.c.bf16 %v3836_v32, %v3842_v50  ;;  %v1525_v30 = vrot.slane %v3542_v54, 2  ;;  %v459_v3 = vpack.c.bf16 %v3869_v40, %v3873_v43  ;;  %v1552_v51 = vsel %vm1541_vm4, %v1527_v24, %v1529_v58 }
 0x15a   :  { %2853 = vmatprep.mubr.msk.bf16.mxu0 %vm89_vm0, %v456_v41  ;;  %2948 = vmatpush3.bf16.msra.mxu1 %v3147_v34  ;;  %v1345_v34 = vrot.slane %v3658_v12, 1  ;;  %v3883_v41 = vsel %vm437_vm3, %v426_v23, %v428_v28  ;;  %v3915_v14 = vsel %vm437_vm3, %v432_v7, %v434_v47  ;;  %v1535_v26 = vrot.slane %v3554_v21, 2 }
 0x15b   :  { %2866 = vmatpush3.bf16.msra.mxu0 %v3646_v37  ;;  %2965 = vmatprep.subr.bf16.mxu1 %v3791_v36  ;;  %v3831_v37 = vld [vmem:[%s4577_s5 + $0x30] sm:$0xff]   ;;  %v460_v45 = vpack.c.bf16 %v3879_v8, %v3883_v41  ;;  %v1537_v27 = vrot.slane %v3625_v56, 2  ;;  %v782_v28 = vrot.slane %v3546_v59, 6 }
 0x15c   :  { %2867 = vmatprep.subr.bf16.mxu0 %v3149_v6  ;;  %v1362_v46 = vsel %vm1346_vm2, %v1345_v34, %v1331_v13 }
 0x15d   :  { %2934 = vmatmul.mubr.msk.bf16.gmra.mrb[4].mxu1 %vm89_vm0, %v1366_v49  ;;  %v778_v49 = vrot.slane %v3542_v54, 6 }
 0x15e   :  { %2937 = vmatprep.mubr.msk.bf16.mxu1 %vm89_vm0, %v1367_v52  ;;  %v1554_v52 = vsel %vm1541_vm4, %v1525_v30, %v1527_v24  ;;  %v1544_v24 = vsel %vm1541_vm4, %v1535_v26, %v1537_v27 }
 0x15f   :  { %2868 = vmatpush3.bf16.msra.mxu0 %v3149_v6  ;;  %v1348_v6 = vsel %vm1346_vm2, %v1343_v42, %v1345_v34  ;;  %v1531_v42 = vrot.slane %v3548_v62, 2  ;;  %v807_v22 = vsel %vm794_vm5, %v778_v49, %v780_v48  ;;  %v809_v23 = vsel %vm794_vm5, %v792_v61, %v778_v49 }
 0x160   :  { %2885 = vmatprep.subr.bf16.mxu0 %v3831_v37  ;;  %v1370_v13 = vpack.c.bf16 %v1362_v46, %v1348_v6  ;;  %v786_v6 = vrot.slane %v3550_v63, 6  ;;  %v1539_v46 = vrot.slane %v3560_v10, 2  ;;  %v805_v49 = vsel %vm794_vm5, %v780_v48, %v782_v28 }
 0x161   :  { %2854 = vmatmul.mubr.msk.bf16.gmra.mrb[20].mxu0 %vm89_vm0, %v457_v1  ;;  %v1558_v1 = vpack.c.bf16 %v1552_v51, %v1554_v52  ;;  %v1548_v34 = vsel %vm1541_vm4, %v1531_v42, %v1533_v20 }
 0x162   :  { %2857 = vmatprep.mubr.msk.bf16.mxu0 %vm89_vm0, %v458_v18  ;;  %v3919_v18 = vsel %vm437_vm3, %v430_v29, %v432_v7  ;;  %v1550_v29 = vsel %vm1541_vm4, %v1529_v58, %v1531_v42  ;;  %v3151_v7 = vld [vmem:[%s4577_s5 + $0x78] sm:$0xff]  }
 0x163   :  { %v461_v47 = vpack.c.bf16 %v3915_v14, %v3919_v18  ;;  %v1559_v58 = vpack.c.bf16 %v1548_v34, %v1550_v29  ;;  %v793_v34 = vrot.slane %v3658_v12, 6 }
 0x165   :  { %2938 = vmatmul.mubr.msk.bf16.gmra.mrb[8].mxu1 %vm89_vm0, %v1368_v31  ;;  %v811_v31 = vpack.c.bf16 %v807_v22, %v809_v23  ;;  %v1530_v22 = vrot.slane %v3661_v15, 2  ;;  %v1542_v23 = vsel %vm1541_vm4, %v1537_v27, %v1539_v46  ;;  %v3153_v27 = vld [vmem:[%s4577_s5 + $0x38] sm:$0xff]  }
 0x166   :  { %2941 = vmatprep.mubr.msk.bf16.mxu1 %vm89_vm0, %v1369_v39  ;;  %v784_v39 = vrot.slane %v3548_v62, 6 }
 0x168   :  { %v803_v52 = vsel %vm794_vm5, %v782_v28, %v784_v39  ;;  %v3972_v28 = vld [vmem:[%s4577_s5 + $0x80] sm:$0xff]  }
 0x169   :  { %2858 = vmatmul.mubr.msk.bf16.gmra.mrb[24].mxu0 %vm89_vm0, %v459_v3  ;;  %v1546_v3 = vsel %vm1541_vm4, %v1533_v20, %v1535_v26  ;;  %v1528_v20 = vrot.slane %v3652_v5, 2  ;;  %v812_v48 = vpack.c.bf16 %v803_v52, %v805_v49  ;;  %v1556_v26 = vsel %vm1541_vm4, %v1539_v46, %v1525_v30 }
 0x16a   :  { %2861 = vmatprep.mubr.msk.bf16.mxu0 %vm89_vm0, %v460_v45  ;;  %v788_v45 = vrot.slane %v3554_v21, 6  ;;  %v1560_v51 = vpack.c.bf16 %v1544_v24, %v1546_v3  ;;  %v1532_v24 = vrot.slane %v3666_v19, 2  ;;  %v1534_v3 = vrot.slane %v3676_v25, 2 }
 0x16b   :  { %v1553_v30 = vsel %vm1541_vm4, %v1528_v20, %v1530_v22 }
 0x16c   :  { %v799_v42 = vsel %vm794_vm5, %v786_v6, %v788_v45  ;;  %v1549_v52 = vsel %vm1541_vm4, %v1532_v24, %v1534_v3 }
 0x16d   :  { %2942 = vmatmul.mubr.msk.bf16.gmra.mrb[12].mxu1 %vm89_vm0, %v1370_v13  ;;  %v1526_v13 = vrot.slane %v3648_v60, 2 }
 0x16e   :  { %2949 = vmatprep.mubr.msk.bf16.mxu1 %vm89_vm0, %v1558_v1  ;;  %v801_v1 = vsel %vm794_vm5, %v784_v39, %v786_v6  ;;  %v1561_v6 = vpack.c.bf16 %v1556_v26, %v1542_v23  ;;  %v787_v23 = vrot.slane %v3676_v25, 6  ;;  %v1915_v26 = vpack.c.bf16 %v3772_v35, %v3733_v9 }
 0x16f   :  { %v813_v29 = vpack.c.bf16 %v799_v42, %v801_v1  ;;  %v1555_v39 = vsel %vm1541_vm4, %v1526_v13, %v1528_v20  ;;  %v1551_v1 = vsel %vm1541_vm4, %v1530_v22, %v1532_v24  ;;  %v783_v20 = vrot.slane %v3661_v15, 6 }
 0x170   :  { %v1562_v49 = vpack.c.bf16 %v1553_v30, %v1555_v39  ;;  %v1919_v30 = vpack.c.bf16 %v3873_v43, %v3836_v32  ;;  %v1563_v39 = vpack.c.bf16 %v1549_v52, %v1551_v1  ;;  %v1540_v24 = vrot.slane %v3658_v12, 2 }
 0x171   :  { %2862 = vmatmul.mubr.msk.bf16.gmra.mrb[28].mxu0 %vm89_vm0, %v461_v47  ;;  %v790_v47 = vrot.slane %v3625_v56, 6  ;;  %v1722_v52 = vrot.slane %v3544_v55, 3 }
 0x172   :  { %2869 = vmatprep.mubr.msk.bf16.mxu0 %vm89_vm0, %v811_v31  ;;  %v781_v31 = vrot.slane %v3652_v5, 6 }
 0x173   :  { %v797_v46 = vsel %vm794_vm5, %v788_v45, %v790_v47  ;;  %v1538_v45 = vrot.slane %v3703_v38, 2 }
 0x175   :  { %2950 = vmatmul.mubr.msk.bf16.vlgmr.msra.gmra.mrb[0].mxu1 %vm89_vm0, %v1559_v58  ;;  %v795_v58 = vsel %vm794_vm5, %v790_v47, %v792_v61  ;;  %v1536_v61 = vrot.slane %v3540_v53, 2  ;;  %v1917_v47 = vpack.c.bf16 %v3825_v0, %v3779_v44 }
 0x176   :  { %2966 = vmatpush3.bf16.msra.mxu1 %v3791_v36  ;;  %2953 = vmatprep.mubr.msk.bf16.mxu1 %vm89_vm0, %v1560_v51  ;;  %v779_v36 = vrot.slane %v3648_v60, 6 }
 0x177   :  { %2967 = vmatprep.subr.bf16.mxu1 %v3151_v7  ;;  %v1545_v22 = vsel %vm1541_vm4, %v1536_v61, %v1538_v45 }
 0x178   :  { %v808_v51 = vsel %vm794_vm5, %v779_v36, %v781_v31 }
 0x179   :  { %2870 = vmatmul.mubr.msk.bf16.vlgmr.msra.gmra.mrb[16].mxu0 %vm89_vm0, %v812_v48  ;;  %v785_v48 = vrot.slane %v3666_v19, 6 }
 0x17a   :  { %2873 = vmatprep.mubr.msk.bf16.mxu0 %vm89_vm0, %v813_v29  ;;  %2968 = vmatpush3.bf16.msra.mxu1 %v3151_v7  ;;  %v810_v7 = vsel %vm794_vm5, %v793_v34, %v779_v36  ;;  %v1918_v29 = vpack.c.bf16 %v3739_v11, %v3821_v57  ;;  %v1547_v36 = vsel %vm1541_vm4, %v1534_v3, %v1536_v61 }
 0x17b   :  { %2886 = vmatpush3.bf16.msra.mxu0 %v3831_v37  ;;  %2985 = vmatprep.subr.bf16.mxu1 %v3972_v28  ;;  %v814_v37 = vpack.c.bf16 %v795_v58, %v797_v46  ;;  %v815_v42 = vpack.c.bf16 %v808_v51, %v810_v7  ;;  %v1921_v58 = vpack.c.bf16 %v3919_v18, %v3879_v8  ;;  %v1720_v7 = vrot.slane %v3542_v54, 3 }
 0x17c   :  { %2887 = vmatprep.subr.bf16.mxu0 %v3153_v27  ;;  %v1922_v46 = vpack.c.bf16 %v3842_v50, %v3915_v14  ;;  %v1564_v3 = vpack.c.bf16 %v1545_v22, %v1547_v36  ;;  %v806_v51 = vsel %vm794_vm5, %v781_v31, %v783_v20  ;;  %v1543_v31 = vsel %vm1541_vm4, %v1538_v45, %v1540_v24 }
 0x17d   :  { %2954 = vmatmul.mubr.msk.bf16.gmra.mrb[4].mxu1 %vm89_vm0, %v1561_v6  ;;  %v1920_v6 = vpack.c.bf16 %v3883_v41, %v3869_v40  ;;  %v1557_v22 = vsel %vm1541_vm4, %v1540_v24, %v1526_v13  ;;  %v1749_v45 = vsel %vm1736_vm6, %v1720_v7, %v1722_v52  ;;  %v1726_v24 = vrot.slane %v3548_v62, 3 }
 0x17e   :  { %2957 = vmatprep.mubr.msk.bf16.mxu1 %vm89_vm0, %v1562_v49  ;;  %v804_v49 = vsel %vm794_vm5, %v783_v20, %v785_v48  ;;  %v1565_v13 = vpack.c.bf16 %v1557_v22, %v1543_v31  ;;  %v1730_v31 = vrot.slane %v3554_v21, 3  ;;  %v3184_v8 = vmov 0  }
 0x17f   :  { %2888 = vmatpush3.bf16.msra.mxu0 %v3153_v27  ;;  %v789_v27 = vrot.slane %v3540_v53, 6  ;;  %v816_v1 = vpack.c.bf16 %v804_v49, %v806_v51  ;;  %3135 = vset.pattern.permute.xlu0 %v3184_v8 }
 0x181   :  { %2874 = vmatmul.mubr.msk.bf16.gmra.mrb[20].mxu0 %vm89_vm0, %v814_v37  ;;  %v800_v61 = vsel %vm794_vm5, %v787_v23, %v789_v27  ;;  %v802_v37 = vsel %vm794_vm5, %v785_v48, %v787_v23  ;;  %v791_v48 = vrot.slane %v3703_v38, 6  ;;  %v973_v23 = vrot.slane %v3542_v54, 7 }
 0x182   :  { %2877 = vmatprep.mubr.msk.bf16.mxu0 %vm89_vm0, %v815_v42  ;;  %v1724_v42 = vrot.slane %v3546_v59, 3  ;;  %v817_v20 = vpack.c.bf16 %v800_v61, %v802_v37  ;;  %v1728_v37 = vrot.slane %v3550_v63, 3 }
 0x183   :  { %v796_v51 = vsel %vm794_vm5, %v791_v48, %v793_v34  ;;  %v798_v61 = vsel %vm794_vm5, %v789_v27, %v791_v48  ;;  %v977_v34 = vrot.slane %v3546_v59, 7  ;;  %v979_v48 = vrot.slane %v3548_v62, 7 }
 0x184   :  { %v1747_v36 = vsel %vm1736_vm6, %v1722_v52, %v1724_v42  ;;  %v1745_v27 = vsel %vm1736_vm6, %v1724_v42, %v1726_v24  ;;  %v818_v22 = vpack.c.bf16 %v796_v51, %v798_v61  ;;  %v1741_v2 = vsel %vm1736_vm6, %v1728_v37, %v1730_v31 }
 0x185   :  { %2958 = vmatmul.mubr.msk.bf16.gmra.mrb[8].mxu1 %vm89_vm0, %v1563_v39  ;;  %v975_v39 = vrot.slane %v3544_v55, 7  ;;  %v1753_v49 = vpack.c.bf16 %v1747_v36, %v1749_v45  ;;  %v1743_v45 = vsel %vm1736_vm6, %v1726_v24, %v1728_v37  ;;  %v1734_v51 = vrot.slane %v3560_v10, 3 }
 0x186   :  { %2961 = vmatprep.mubr.msk.bf16.mxu1 %vm89_vm0, %v1564_v3  ;;  %v987_v3 = vrot.slane %v3560_v10, 7  ;;  %v1754_v24 = vpack.c.bf16 %v1743_v45, %v1745_v27  ;;  %v998_v61 = vsel %vm989_vm7, %v977_v34, %v979_v48  ;;  %v1725_v27 = vrot.slane %v3661_v15, 3 }
 0x187   :  { %v1002_v52 = vsel %vm989_vm7, %v973_v23, %v975_v39  ;;  %v1000_v42 = vsel %vm989_vm7, %v975_v39, %v977_v34 }
 0x188   :  { %v1007_v34 = vpack.c.bf16 %v998_v61, %v1000_v42  ;;  %v976_v42 = vrot.slane %v3652_v5, 7 }
 0x189   :  { %2878 = vmatmul.mubr.msk.bf16.gmra.mrb[24].mxu0 %vm89_vm0, %v816_v1  ;;  %v1004_v1 = vsel %vm989_vm7, %v987_v3, %v973_v23  ;;  %v981_v23 = vrot.slane %v3550_v63, 7 }
 0x18a   :  { %2881 = vmatprep.mubr.msk.bf16.mxu0 %vm89_vm0, %v817_v20  ;;  %v1732_v20 = vrot.slane %v3625_v56, 3  ;;  %v1006_v36 = vpack.c.bf16 %v1002_v52, %v1004_v1  ;;  %v1721_v52 = vrot.slane %v3648_v60, 3  ;;  %v1723_v1 = vrot.slane %v3652_v5, 3 }
 0x18d   :  { %2962 = vmatmul.mubr.msk.bf16.gmra.mrb[12].mxu1 %vm89_vm0, %v1565_v13  ;;  %v983_v13 = vrot.slane %v3554_v21, 7 }
 0x18e   :  { %2969 = vmatprep.mubr.msk.bf16.mxu1 %vm89_vm0, %v1753_v49  ;;  %v1739_v49 = vsel %vm1736_vm6, %v1730_v31, %v1732_v20  ;;  %v996_v31 = vsel %vm989_vm7, %v979_v48, %v981_v23  ;;  %v1750_v48 = vsel %vm1736_vm6, %v1721_v52, %v1723_v1 }
 0x18f   :  { %v1755_v37 = vpack.c.bf16 %v1739_v49, %v1741_v2  ;;  %v994_v39 = vsel %vm989_vm7, %v981_v23, %v983_v13  ;;  %v1751_v2 = vsel %vm1736_vm6, %v1734_v51, %v1720_v7  ;;  %v985_v23 = vrot.slane %v3625_v56, 7 }
 0x190   :  { %v1008_v45 = vpack.c.bf16 %v994_v39, %v996_v31  ;;  %v974_v49 = vrot.slane %v3648_v60, 7  ;;  %v1727_v39 = vrot.slane %v3666_v19, 3  ;;  %v1729_v31 = vrot.slane %v3676_v25, 3 }
 0x191   :  { %2882 = vmatmul.mubr.msk.bf16.gmra.mrb[28].mxu0 %vm89_vm0, %v818_v22  ;;  %v3155_v22 = vld [vmem:[%s4577_s5 + $0x88] sm:$0xff]   ;;  %v992_v61 = vsel %vm989_vm7, %v983_v13, %v985_v23 }
 0x192   :  { %2889 = vmatprep.mubr.msk.bf16.mxu0 %vm89_vm0, %v1006_v36  ;;  %v1737_v36 = vsel %vm1736_vm6, %v1732_v20, %v1734_v51  ;;  %v988_v20 = vrot.slane %v3658_v12, 7 }
 0x193   :  { %v1756_v7 = vpack.c.bf16 %v1751_v2, %v1737_v36  ;;  %v1744_v36 = vsel %vm1736_vm6, %v1727_v39, %v1729_v31  ;;  %v978_v2 = vrot.slane %v3661_v15, 7 }
 0x195   :  { %2970 = vmatmul.mubr.msk.bf16.vlgmr.msra.gmra.mrb[0].mxu1 %vm89_vm0, %v1754_v24  ;;  %v990_v24 = vsel %vm989_vm7, %v985_v23, %v987_v3 }
 0x196   :  { %2986 = vmatpush3.bf16.msra.mxu1 %v3972_v28  ;;  %2973 = vmatprep.mubr.msk.bf16.mxu1 %vm89_vm0, %v1755_v37  ;;  %v1748_v28 = vsel %vm1736_vm6, %v1723_v1, %v1725_v27  ;;  %v1003_v1 = vsel %vm989_vm7, %v974_v49, %v976_v42  ;;  %v1005_v37 = vsel %vm989_vm7, %v988_v20, %v974_v49  ;;  %v982_v49 = vrot.slane %v3676_v25, 7 }
 0x197   :  { %2987 = vmatprep.subr.bf16.mxu1 %v3155_v22  ;;  %v1757_v51 = vpack.c.bf16 %v1748_v28, %v1750_v48  ;;  %v1009_v3 = vpack.c.bf16 %v990_v24, %v992_v61  ;;  %v1010_v13 = vpack.c.bf16 %v1003_v1, %v1005_v37  ;;  %v980_v48 = vrot.slane %v3666_v19, 7 }
 0x198   :  { %v1001_v61 = vsel %vm989_vm7, %v976_v42, %v978_v2  ;;  %v1735_v1 = vrot.slane %v3658_v12, 3 }
 0x199   :  { %2890 = vmatmul.mubr.msk.bf16.vlgmr.msra.gmra.mrb[16].mxu0 %vm89_vm0, %v1007_v34  ;;  %v1733_v34 = vrot.slane %v3703_v38, 3  ;;  %v999_v24 = vsel %vm989_vm7, %v978_v2, %v980_v48 }
 0x19a   :  { %2893 = vmatprep.mubr.msk.bf16.mxu0 %vm89_vm0, %v1008_v45  ;;  %2988 = vmatpush3.bf16.msra.mxu1 %v3155_v22  ;;  %v1731_v22 = vrot.slane %v3540_v53, 3  ;;  %v1746_v45 = vsel %vm1736_vm6, %v1725_v27, %v1727_v39  ;;  %v997_v39 = vsel %vm989_vm7, %v980_v48, %v982_v49  ;;  %v1752_v42 = vsel %vm1736_vm6, %v1735_v1, %v1721_v52 }
 0x19c   :  { %v1740_v23 = vsel %vm1736_vm6, %v1731_v22, %v1733_v34  ;;  %v1742_v28 = vsel %vm1736_vm6, %v1729_v31, %v1731_v22  ;;  %v1011_v31 = vpack.c.bf16 %v999_v24, %v1001_v61 }
 0x19d   :  { %2974 = vmatmul.mubr.msk.bf16.gmra.mrb[4].mxu1 %vm89_vm0, %v1756_v7  ;;  %v984_v7 = vrot.slane %v3540_v53, 7  ;;  %v1759_v27 = vpack.c.bf16 %v1740_v23, %v1742_v28 }
 0x19e   :  { %2977 = vmatprep.mubr.msk.bf16.mxu1 %vm89_vm0, %v1757_v51  ;;  %v1758_v51 = vpack.c.bf16 %v1744_v36, %v1746_v45 }
 0x19f   :  { %v995_v37 = vsel %vm989_vm7, %v982_v49, %v984_v7 }
 0x1a0   :  { %v1012_v22 = vpack.c.bf16 %v995_v37, %v997_v39 }
 0x1a1   :  { %2894 = vmatmul.mubr.msk.bf16.gmra.mrb[20].mxu0 %vm89_vm0, %v1009_v3  ;;  %v1738_v3 = vsel %vm1736_vm6, %v1733_v34, %v1735_v1 }
 0x1a2   :  { %2897 = vmatprep.mubr.msk.bf16.mxu0 %vm89_vm0, %v1010_v13  ;;  %v986_v13 = vrot.slane %v3703_v38, 7  ;;  %v1760_v36 = vpack.c.bf16 %v1752_v42, %v1738_v3 }
 0x1a4   :  { %v991_v45 = vsel %vm989_vm7, %v986_v13, %v988_v20  ;;  %v993_v2 = vsel %vm989_vm7, %v984_v7, %v986_v13 }
 0x1a5   :  { %2978 = vmatmul.mubr.msk.bf16.gmra.mrb[8].mxu1 %vm89_vm0, %v1758_v51  ;;  %v1013_v52 = vpack.c.bf16 %v991_v45, %v993_v2 }
 0x1a6   :  { %2981 = vmatprep.mubr.msk.bf16.mxu1 %vm89_vm0, %v1759_v27 }
 0x1a9   :  { %2898 = vmatmul.mubr.msk.bf16.gmra.mrb[24].mxu0 %vm89_vm0, %v1011_v31 }
 0x1aa   :  { %2901 = vmatprep.mubr.msk.bf16.mxu0 %vm89_vm0, %v1012_v22 }
 0x1ad   :  { %2982 = vmatmul.mubr.msk.bf16.gmra.mrb[12].mxu1 %vm89_vm0, %v1760_v36 }
 0x1ae   :  { %2989 = vmatprep.mubr.msk.bf16.mxu1 %vm89_vm0, %v1915_v26 }
 0x1b1   :  { %2902 = vmatmul.mubr.msk.bf16.gmra.mrb[28].mxu0 %vm89_vm0, %v1013_v52 }
 0x1b5   :  { %2990 = vmatmul.mubr.msk.bf16.vlgmr.msra.gmra.mrb[0].mxu1 %vm89_vm0, %v1916_v33 }
 0x1b6   :  { %2993 = vmatprep.mubr.msk.bf16.mxu1 %vm89_vm0, %v1917_v47  ;;  %v4235_v47 = vld [vmem:[%s4578_s6] ss:$0 sm:$0xff] }
 0x1bd   :  { %2994 = vmatmul.mubr.msk.bf16.gmra.mrb[4].mxu1 %vm89_vm0, %v1918_v29 }
 0x1be   :  { %2997 = vmatprep.mubr.msk.bf16.mxu1 %vm89_vm0, %v1919_v30 }
 0x1c5   :  { %2998 = vmatmul.mubr.msk.bf16.gmra.mrb[8].mxu1 %vm89_vm0, %v1920_v6 }
 0x1c6   :  { %3001 = vmatprep.mubr.msk.bf16.mxu1 %vm89_vm0, %v1921_v58 }
 0x1cd   :  { %3002 = vmatmul.mubr.msk.bf16.gmra.mrb[12].mxu1 %vm89_vm0, %v1922_v46 }
 0x26c   :  { %v2891_v9 = vpop.f32.mrb[16].mxu0 }
 0x26d   :  { %v1089_v11 = vpop.f32.mrb[17].mxu0 }
 0x26e   :  { %v2892_v16 = vpop.f32.mrb[18].mxu0 }
 0x26f   :  { %v1092_v17 = vpop.f32.mrb[19].mxu0 }
 0x274   :  { %v2895_v33 = vpop.f32.mrb[20].mxu0 }
 0x275   :  { %v1105_v35 = vpop.f32.mrb[21].mxu0 }
 0x276   :  { %v2896_v44 = vpop.f32.mrb[22].mxu0 }
 0x277   :  { %v1108_v57 = vpop.f32.mrb[23].mxu0 }
 0x27c   :  { %v4216_v0 = vpop.f32.mrb[24].mxu0 }
 0x27d   :  { %v4218_v32 = vpop.f32.mrb[25].mxu0 }
 0x27e   :  { %v4220_v40 = vpop.f32.mrb[26].mxu0 }
 0x27f   :  { %v4222_v43 = vpop.f32.mrb[27].mxu0 }
 0x284   :  { %v4224_v50 = vpop.f32.mrb[28].mxu0 }
 0x285   :  { %v4226_v41 = vpop.f32.mrb[29].mxu0 }
 0x286   :  { %v4228_v14 = vpop.f32.mrb[30].mxu0 }
 0x287   :  { %v4230_v18 = vpop.f32.mrb[31].mxu0 }
 0x288   :  { %v2991_v26 = vpop.f32.mrb[0].mxu1 }
 0x289   :  { %v3005_v29 = vadd.f32 %v2991_v26, %v2891_v9  ;;  %v1998_v30 = vpop.f32.mrb[1].mxu1 }
 0x28a   :  { %v3006_v6 = vadd.f32 %v1998_v30, %v1089_v11  ;;  %v2992_v58 = vpop.f32.mrb[2].mxu1 }
 0x28b   :  { %v4238_v46 = vadd.f32 %v3005_v29, %v4235_v47  ;;  %v3007_v20 = vadd.f32 %v2992_v58, %v2892_v16  ;;  %v2001_v34 = vpop.f32.mrb[3].mxu1 }
 0x28c   :  { %v4241_v48 = vadd.f32 %v3006_v6, %v4235_v47  ;;  %v3008_v23 = vadd.f32 %v2001_v34, %v1092_v17 }
 0x28d   :  { %v4246_v49 = vadd.f32 %v3007_v20, %v4235_v47  ;;  %v2142_v51 = vmul.f32 %v4238_v46, %v4238_v46  ;;  %v2105_v37 = vsel %vm89_vm0, %v4238_v46, 0.0 }
 0x28e   :  { %v2140_v28 = vmul.f32 %v4241_v48, %v4241_v48  ;;  %v4249_v7 = vadd.f32 %v3008_v23, %v4235_v47  ;;  %v2102_v27 = vsel %vm89_vm0, %v4241_v48, 0.0 }
 0x28f   :  { %v2143_v42 = vmul.f32 %v4246_v49, %v4246_v49  ;;  %v2159_v2 = vsel %vm89_vm0, %v2142_v51, 0.0  ;;  %v2107_v17 = vsel %vm89_vm0, %v4246_v49, 0.0 }
 0x290   :  { %v2103_v24 = vsel %vm89_vm0, %v4249_v7, 0.0  ;;  %v2141_v61 = vmul.f32 %v4249_v7, %v4249_v7  ;;  %v2995_v1 = vpop.f32.mrb[4].mxu1  ;;  %v2156_v3 = vsel %vm89_vm0, %v2140_v28, 0.0 }
 0x291   :  { %v2104_v39 = vadd.f32 %v2103_v24, %v2102_v27  ;;  %v3009_v31 = vadd.f32 %v2995_v1, %v2895_v33  ;;  %v2014_v22 = vpop.f32.mrb[5].mxu1 }
 0x292   :  { %v2157_v13 = vsel %vm89_vm0, %v2141_v61, 0.0  ;;  %v3010_v36 = vadd.f32 %v2014_v22, %v1105_v35  ;;  %v2996_v45 = vpop.f32.mrb[6].mxu1  ;;  %v2161_v35 = vsel %vm89_vm0, %v2143_v42, 0.0 }
 0x293   :  { %v2106_v52 = vadd.f32 %v2105_v37, %v2104_v39  ;;  %v2158_v9 = vadd.f32 %v2157_v13, %v2156_v3  ;;  %v3011_v11 = vadd.f32 %v2996_v45, %v2896_v44  ;;  %v2017_v16 = vpop.f32.mrb[7].mxu1  ;;  %v4269_v33 = vadd.f32 %v3009_v31, %v4235_v47 }
 0x294   :  { %v4272_v8 = vadd.f32 %v3010_v36, %v4235_v47  ;;  %v3012_v26 = vadd.f32 %v2017_v16, %v1108_v57 }
 0x295   :  { %v2160_v29 = vadd.f32 %v2159_v2, %v2158_v9  ;;  %v2108_v30 = vadd.f32 %v2107_v17, %v2106_v52  ;;  %v4283_v23 = vadd.f32 %v3011_v11, %v4235_v47  ;;  %v2146_v57 = vmul.f32 %v4269_v33, %v4269_v33 }
 0x296   :  { %v2109_v6 = vsel %vm89_vm0, %v4272_v8, 0.0  ;;  %v2144_v44 = vmul.f32 %v4272_v8, %v4272_v8  ;;  %v4280_v58 = vadd.f32 %v3012_v26, %v4235_v47  ;;  %v2113_v31 = vsel %vm89_vm0, %v4269_v33, 0.0 }
 0x297   :  { %v2110_v20 = vadd.f32 %v2109_v6, %v2108_v30  ;;  %v2162_v34 = vadd.f32 %v2161_v35, %v2160_v29  ;;  %v2147_v42 = vmul.f32 %v4283_v23, %v4283_v23  ;;  %v2115_v52 = vsel %vm89_vm0, %v4283_v23, 0.0 }
 0x298   :  { %v2163_v28 = vsel %vm89_vm0, %v2144_v44, 0.0  ;;  %v2111_v51 = vsel %vm89_vm0, %v4280_v58, 0.0  ;;  %v2999_v27 = vpop.f32.mrb[8].mxu1  ;;  %v2145_v1 = vmul.f32 %v4280_v58, %v4280_v58 }
 0x299   :  { %v2164_v24 = vadd.f32 %v2163_v28, %v2162_v34  ;;  %v2112_v61 = vadd.f32 %v2111_v51, %v2110_v20  ;;  %v3013_v37 = vadd.f32 %v2999_v27, %v4216_v0  ;;  %v2030_v39 = vpop.f32.mrb[9].mxu1  ;;  %v2169_v35 = vsel %vm89_vm0, %v2147_v42, 0.0 }
 0x29a   :  { %v3014_v22 = vadd.f32 %v2030_v39, %v4218_v32  ;;  %v3000_v3 = vpop.f32.mrb[10].mxu1  ;;  %v2165_v36 = vsel %vm89_vm0, %v2145_v1, 0.0  ;;  %v2167_v32 = vsel %vm89_vm0, %v2146_v57, 0.0 }
 0x29b   :  { %v2114_v13 = vadd.f32 %v2113_v31, %v2112_v61  ;;  %v3015_v45 = vadd.f32 %v3000_v3, %v4220_v40  ;;  %v2033_v2 = vpop.f32.mrb[11].mxu1  ;;  %v2166_v0 = vadd.f32 %v2165_v36, %v2164_v24  ;;  %v4308_v16 = vadd.f32 %v3013_v37, %v4235_v47 }
 0x29c   :  { %v4303_v9 = vadd.f32 %v3014_v22, %v4235_v47  ;;  %v3016_v11 = vadd.f32 %v2033_v2, %v4222_v43 }
 0x29d   :  { %v2116_v17 = vadd.f32 %v2115_v52, %v2114_v13  ;;  %v2168_v26 = vadd.f32 %v2167_v32, %v2166_v0  ;;  %v4319_v43 = vadd.f32 %v3015_v45, %v4235_v47  ;;  %v2150_v51 = vmul.f32 %v4308_v16, %v4308_v16 }
 0x29e   :  { %v2117_v40 = vsel %vm89_vm0, %v4303_v9, 0.0  ;;  %v2148_v29 = vmul.f32 %v4303_v9, %v4303_v9  ;;  %v4315_v30 = vadd.f32 %v3016_v11, %v4235_v47  ;;  %v2121_v1 = vsel %vm89_vm0, %v4308_v16, 0.0 }
 0x29f   :  { %v2118_v6 = vadd.f32 %v2117_v40, %v2116_v17  ;;  %v2170_v44 = vadd.f32 %v2169_v35, %v2168_v26  ;;  %v2151_v3 = vmul.f32 %v4319_v43, %v4319_v43  ;;  %v2175_v0 = vsel %vm89_vm0, %v2150_v51, 0.0 }
 0x2a0   :  { %v2171_v20 = vsel %vm89_vm0, %v2148_v29, 0.0  ;;  %v2119_v34 = vsel %vm89_vm0, %v4315_v30, 0.0  ;;  %v2149_v57 = vmul.f32 %v4315_v30, %v4315_v30  ;;  %v3003_v28 = vpop.f32.mrb[12].mxu1 }
 0x2a1   :  { %v2120_v27 = vadd.f32 %v2119_v34, %v2118_v6  ;;  %v3017_v24 = vadd.f32 %v3003_v28, %v4224_v50  ;;  %v2046_v61 = vpop.f32.mrb[13].mxu1  ;;  %v2172_v37 = vadd.f32 %v2171_v20, %v2170_v44  ;;  %v2123_v50 = vsel %vm89_vm0, %v4319_v43, 0.0 }
 0x2a2   :  { %v2173_v39 = vsel %vm89_vm0, %v2149_v57, 0.0  ;;  %v3018_v31 = vadd.f32 %v2046_v61, %v4226_v41  ;;  %v3004_v22 = vpop.f32.mrb[14].mxu1  ;;  %v2177_v40 = vsel %vm89_vm0, %v2151_v3, 0.0 }
 0x2a3   :  { %v2122_v42 = vadd.f32 %v2121_v1, %v2120_v27  ;;  %v3019_v13 = vadd.f32 %v3004_v22, %v4228_v14  ;;  %v2049_v36 = vpop.f32.mrb[15].mxu1  ;;  %v2174_v45 = vadd.f32 %v2173_v39, %v2172_v37  ;;  %v4344_v41 = vadd.f32 %v3017_v24, %v4235_v47 }
 0x2a4   :  { %v4339_v2 = vadd.f32 %v3018_v31, %v4235_v47  ;;  %v3020_v52 = vadd.f32 %v2049_v36, %v4230_v18 }
 0x2a5   :  { %v2124_v11 = vadd.f32 %v2123_v50, %v2122_v42  ;;  %v2176_v32 = vadd.f32 %v2175_v0, %v2174_v45  ;;  %v4353_v18 = vadd.f32 %v3019_v13, %v4235_v47  ;;  %v2154_v34 = vmul.f32 %v4344_v41, %v4344_v41 }
 0x2a6   :  { %v2125_v14 = vsel %vm89_vm0, %v4339_v2, 0.0  ;;  %v2152_v17 = vmul.f32 %v4339_v2, %v4339_v2  ;;  %v2097_v26 = vadd.f32 %v3020_v52, %v4235_v47  ;;  %v2129_v28 = vsel %vm89_vm0, %v4344_v41, 0.0 }
 0x2a7   :  { %v2126_v29 = vadd.f32 %v2125_v14, %v2124_v11  ;;  %v2178_v35 = vadd.f32 %v2177_v40, %v2176_v32  ;;  %v2155_v47 = vmul.f32 %v4353_v18, %v4353_v18  ;;  %v2131_v61 = vsel %vm89_vm0, %v4353_v18, 0.0 }
 0x2a8   :  { %v2179_v6 = vsel %vm89_vm0, %v2152_v17, 0.0  ;;  %v2127_v44 = vsel %vm89_vm0, %v2097_v26, 0.0  ;;  %v2153_v20 = vmul.f32 %v2097_v26, %v2097_v26  ;;  %v2183_v37 = vsel %vm89_vm0, %v2154_v34, 0.0 }
 0x2a9   :  { %v2128_v57 = vadd.f32 %v2127_v44, %v2126_v29  ;;  %v2180_v51 = vadd.f32 %v2179_v6, %v2178_v35  ;;  %v2185_v22 = vsel %vm89_vm0, %v2155_v47, 0.0 }
 0x2aa   :  { %v2181_v27 = vsel %vm89_vm0, %v2153_v20, 0.0 }
 0x2ab   :  { %v2130_v24 = vadd.f32 %v2129_v28, %v2128_v57  ;;  %v2182_v1 = vadd.f32 %v2181_v27, %v2180_v51 }
 0x2ad   :  { %v2132_v39 = vadd.f32 %v2131_v61, %v2130_v24  ;;  %v2184_v31 = vadd.f32 %v2183_v37, %v2182_v1  ;;  %v4408_v1 = vld [vmem:[%s4579_s7] ss:$0 sm:$0xff] }
 0x2af   :  { %v2133_v3 = vrot.slane %v2132_v39, 4  ;;  %v2186_v42 = vadd.f32 %v2185_v22, %v2184_v31 }
 0x2b1   :  { %v2134_v13 = vadd.f32 %v2133_v3, %v2132_v39  ;;  %v2187_v36 = vrot.slane %v2186_v42, 4  ;;  %v4419_v3 = vld [vmem:[%s4580_s8] ss:$0 sm:$0xff] }
 0x2b3   :  { %v2135_v50 = vrot.slane %v2134_v13, 2  ;;  %v2188_v45 = vadd.f32 %v2187_v36, %v2186_v42 }
 0x2b5   :  { %v2136_v52 = vadd.f32 %v2135_v50, %v2134_v13  ;;  %v2189_v0 = vrot.slane %v2188_v45, 2 }
 0x2b7   :  { %v2137_v11 = vrot.slane %v2136_v52, 1  ;;  %v2190_v32 = vadd.f32 %v2189_v0, %v2188_v45 }
 0x2b9   :  { %v2138_v14 = vadd.f32 %v2137_v11, %v2136_v52  ;;  %v2191_v17 = vrot.slane %v2190_v32, 1 }
 0x2bb   :  { %v4368_v40 = vmul.f32 0.0078125, %v2138_v14  ;;  %v2192_v29 = vadd.f32 %v2191_v17, %v2190_v32 }
 0x2bd   :  { %v2194_v35 = vmul.f32 %v4368_v40, %v4368_v40  ;;  %v2210_v6 = vsub.f32 %v2097_v26, %v4368_v40  ;;  %v2205_v44 = vsub.f32 %v4303_v9, %v4368_v40  ;;  %v2197_v20 = vsub.f32 %v4241_v48, %v4368_v40 }
 0x2be   :  { %v2193_v34 = vmul.f32 0.0078125, %v2192_v29  ;;  %v2206_v57 = vsub.f32 %v4315_v30, %v4368_v40  ;;  %v2198_v28 = vsub.f32 %v4249_v7, %v4368_v40  ;;  %v2207_v51 = vsub.f32 %v4308_v16, %v4368_v40 }
 0x2bf   :  { %v2199_v27 = vsub.f32 %v4238_v46, %v4368_v40  ;;  %v2208_v26 = vsub.f32 %v4319_v43, %v4368_v40  ;;  %v2200_v9 = vsub.f32 %v4246_v49, %v4368_v40  ;;  %v2209_v48 = vsub.f32 %v4339_v2, %v4368_v40 }
 0x2c0   :  { %v2195_v47 = vsub.f32 %v2193_v34, %v2194_v35  ;;  %v2201_v30 = vsub.f32 %v4272_v8, %v4368_v40  ;;  %v2202_v7 = vsub.f32 %v4280_v58, %v4368_v40  ;;  %v2211_v16 = vsub.f32 %v4344_v41, %v4368_v40 }
 0x2c1   :  { %v2203_v46 = vsub.f32 %v4269_v33, %v4368_v40  ;;  %v2212_v43 = vsub.f32 %v4353_v18, %v4368_v40  ;;  %v2204_v49 = vsub.f32 %v4283_v23, %v4368_v40 }
 0x2c2   :  { %v2196_v2 = vmax.f32 %v2195_v47, 0.0 }
 0x2c4   :  { %v2213_v24 = vadd.f32 1e-05, %v2196_v2 }
 0x2c6   :  { %3158 = vrsqrt.f32 %v2213_v24 }
 0x2d0   :  { %v4403_v61 = vpop.eup %3158 }
 0x2d1   :  { %v4411_v37 = vmul.f32 %v4403_v61, %v2210_v6  ;;  %v2223_v39 = vmul.f32 %v4403_v61, %v2205_v44  ;;  %v2215_v31 = vmul.f32 %v4403_v61, %v2197_v20  ;;  %v2224_v22 = vmul.f32 %v4403_v61, %v2206_v57 }
 0x2d2   :  { %v2216_v42 = vmul.f32 %v4403_v61, %v2198_v28  ;;  %v2225_v13 = vmul.f32 %v4403_v61, %v2207_v51  ;;  %v2217_v36 = vmul.f32 %v4403_v61, %v2199_v27  ;;  %v2226_v50 = vmul.f32 %v4403_v61, %v2208_v26 }
 0x2d3   :  { %v2245_v45 = vmul.f32 %v4408_v1, %v2223_v39  ;;  %v2237_v52 = vmul.f32 %v4408_v1, %v2215_v31  ;;  %v2246_v0 = vmul.f32 %v4408_v1, %v2224_v22  ;;  %v2218_v11 = vmul.f32 %v4403_v61, %v2200_v9 }
 0x2d4   :  { %v2238_v32 = vmul.f32 %v4408_v1, %v2216_v42  ;;  %v2247_v14 = vmul.f32 %v4408_v1, %v2225_v13  ;;  %v2239_v17 = vmul.f32 %v4408_v1, %v2217_v36  ;;  %v2248_v29 = vmul.f32 %v4408_v1, %v2226_v50 }
 0x2d5   :  { %v2267_v35 = vadd.f32 %v4419_v3, %v2245_v45  ;;  %v2259_v6 = vadd.f32 %v4419_v3, %v2237_v52  ;;  %v2268_v44 = vadd.f32 %v4419_v3, %v2246_v0  ;;  %v2240_v20 = vmul.f32 %v4408_v1, %v2218_v11 }
 0x2d6   :  { %v2260_v34 = vadd.f32 %v4419_v3, %v2238_v32  ;;  %v2269_v57 = vadd.f32 %v4419_v3, %v2247_v14  ;;  %v2261_v28 = vadd.f32 %v4419_v3, %v2239_v17  ;;  %v2270_v51 = vadd.f32 %v4419_v3, %v2248_v29  ;;  %v4449_v29 = vld [vmem:[%s4581_s9] ss:$0 sm:$0xff]  ;;  %s3185_s9 = smov [#allocation3]  }
 0x2d7   :  { %v2283_v27 = vmul.f32 0.2, %v2267_v35  ;;  %v2275_v26 = vmul.f32 0.2, %v2259_v6  ;;  %v2284_v9 = vmul.f32 0.2, %v2268_v44  ;;  %v2262_v47 = vadd.f32 %v4419_v3, %v2240_v20 }
 0x2d8   :  { %v2276_v2 = vmul.f32 0.2, %v2260_v34  ;;  %v2285_v24 = vmul.f32 0.2, %v2269_v57  ;;  %v2277_v39 = vmul.f32 0.2, %v2261_v28  ;;  %v2227_v31 = vmul.f32 %v4403_v61, %v2209_v48 }
 0x2d9   :  { %v2299_v22 = vmax.f32 %v2267_v35, %v2283_v27  ;;  %v2291_v42 = vmax.f32 %v2259_v6, %v2275_v26  ;;  %v2300_v13 = vmax.f32 %v2268_v44, %v2284_v9  ;;  %v2286_v36 = vmul.f32 0.2, %v2270_v51  ;;  %s2557_s29 = sshll.u32 %s3185_s9, 4  ;;  %s2558_s29 = int_to_ptr.vmem [resolvable:$true] %s2557_s29 }
 0x2da   :  { %v2292_v50 = vmax.f32 %v2260_v34, %v2276_v2  ;;  %v2301_v45 = vmax.f32 %v2269_v57, %v2285_v24  ;;  %v2293_v52 = vmax.f32 %v2261_v28, %v2277_v39  ;;  %v2278_v0 = vmul.f32 0.2, %v2262_v47  ;;  %s3160_s1 = scalar_lea.vmem %s2558_s29, 32  ;;  %p3165_p1 = scmp.lt.s32.totalorder %s2558_s29, %s2558_s29 }
 0x2db   :  { %v2315_v11 = vadd.f32 %v2299_v22, %v3648_v60  ;;  %v2307_v32 = vadd.f32 %v2291_v42, %v3542_v54  ;;  %v2316_v14 = vadd.f32 %v2300_v13, %v3652_v5  ;;  %v2302_v17 = vmax.f32 %v2270_v51, %v2286_v36  ;;  %p3161_p0 = scmp.ne.s32.totalorder %s2558_s29, %s3160_s1  ;;  %p3166_p2 = scmp.lt.s32.totalorder %s3160_s1, %s3160_s1 }
 0x2dc   :  { %v2308_v48 = vadd.f32 %v2292_v50, %v3544_v55  ;;  %v2317_v35 = vadd.f32 %v2301_v45, %v3661_v15  ;;  %v2309_v6 = vadd.f32 %v2293_v52, %v3546_v59  ;;  %v2294_v44 = vmax.f32 %v2262_v47, %v2278_v0 }
 0x2dd   :  { %v2331_v20 = vmul.f32 0.70710677, %v2315_v11  ;;  %v2323_v34 = vmul.f32 0.70710677, %v2307_v32  ;;  %v2332_v60 = vmul.f32 0.70710677, %v2316_v14  ;;  %v2318_v54 = vadd.f32 %v2302_v17, %v3666_v19  ;;  %p3167_p3 = por %p3166_p2, %p3165_p1 }
 0x2de   :  { %v2324_v57 = vmul.f32 0.70710677, %v2308_v48  ;;  %v2333_v5 = vmul.f32 0.70710677, %v2317_v35  ;;  %v2325_v28 = vmul.f32 0.70710677, %v2309_v6  ;;  %v2310_v51 = vadd.f32 %v2294_v44, %v3548_v62 }
 0x2df   :  { %v2354_v27 = vmul.f32 %v4449_v29, %v2331_v20  ;;  %v2346_v26 = vmul.f32 %v4449_v29, %v2323_v34  ;;  %v2355_v55 = vmul.f32 %v4449_v29, %v2332_v60  ;;  %v2334_v15 = vmul.f32 0.70710677, %v2318_v54  ;;  %p3168_p4 = pnand %p3167_p3, %p3161_p0 }
 0x2e0   :  { %v2347_v59 = vmul.f32 %v4449_v29, %v2324_v57  ;;  %v2356_v9 = vmul.f32 %v4449_v29, %v2333_v5  ;;  %v2348_v47 = vmul.f32 %v4449_v29, %v2325_v28  ;;  %v2326_v2 = vmul.f32 0.70710677, %v2310_v51 }
 0x2e1   :  { %v2386_v19 = vsel %vm89_vm0, %v2354_v27, 0.0  ;;  %v2362_v24 = vsel %vm89_vm0, %v2346_v26, 0.0  ;;  %v2357_v62 = vmul.f32 %v4449_v29, %v2334_v15  ;;  %v2389_v39 = vsel %vm89_vm0, %v2355_v55, 0.0 }
 0x2e2   :  { %2387 = vadd.xlane.f32.xlu1 %v2386_v19  ;;  %2363 = vadd.xlane.f32.xlu0 %v2362_v24  ;;  %v2365_v22 = vsel %vm89_vm0, %v2347_v59, 0.0  ;;  %v2392_v42 = vsel %vm89_vm0, %v2356_v9, 0.0  ;;  %v2349_v13 = vmul.f32 %v4449_v29, %v2326_v2  ;;  %v2368_v36 = vsel %vm89_vm0, %v2348_v47, 0.0 }
 0x2e3   :  { %v2249_v50 = vmul.f32 %v4408_v1, %v2227_v31  ;;  %v2219_v45 = vmul.f32 %v4403_v61, %v2201_v30  ;;  %v2250_v52 = vmul.f32 %v4408_v1, %v4411_v37  ;;  %v2395_v0 = vsel %vm89_vm0, %v2357_v62, 0.0 }
 0x2e4   :  { %v2220_v11 = vmul.f32 %v4403_v61, %v2202_v7  ;;  %v2229_v31 = vmul.f32 %v4403_v61, %v2211_v16  ;;  %v2221_v8 = vmul.f32 %v4403_v61, %v2203_v46  ;;  %v2230_v58 = vmul.f32 %v4403_v61, %v2212_v43 }
 0x2e5   :  { %v2271_v30 = vadd.f32 %v4419_v3, %v2249_v50  ;;  %v2241_v37 = vmul.f32 %v4408_v1, %v2219_v45  ;;  %v2272_v32 = vadd.f32 %v4419_v3, %v2250_v52  ;;  %v2371_v41 = vsel %vm89_vm0, %v2349_v13, 0.0 }
 0x2e6   :  { %2390 = vadd.xlane.f32.xlu1 %v2389_v39  ;;  %2366 = vadd.xlane.f32.xlu0 %v2365_v22  ;;  %v2242_v7 = vmul.f32 %v4408_v1, %v2220_v11  ;;  %v2251_v33 = vmul.f32 %v4408_v1, %v2229_v31  ;;  %v2243_v16 = vmul.f32 %v4408_v1, %v2221_v8 }
 0x2e7   :  { %v2287_v46 = vmul.f32 0.2, %v2271_v30  ;;  %v2263_v14 = vadd.f32 %v4419_v3, %v2241_v37  ;;  %v2288_v17 = vmul.f32 0.2, %v2272_v32  ;;  %v2252_v48 = vmul.f32 %v4408_v1, %v2230_v58  ;;  %v2704_v58 = vld [vmem:[#allocation2] ss:$0 sm:$0xff] }
 0x2e8   :  { %v2264_v18 = vadd.f32 %v4419_v3, %v2242_v7  ;;  %v2273_v43 = vadd.f32 %v4419_v3, %v2251_v33  ;;  %v2265_v35 = vadd.f32 %v4419_v3, %v2243_v16  ;;  %v2222_v6 = vmul.f32 %v4403_v61, %v2204_v49 }
 0x2e9   :  { %v2303_v44 = vmax.f32 %v2271_v30, %v2287_v46  ;;  %v2279_v20 = vmul.f32 0.2, %v2263_v14  ;;  %v2304_v34 = vmax.f32 %v2272_v32, %v2288_v17  ;;  %v2274_v60 = vadd.f32 %v4419_v3, %v2252_v48 }
 0x2ea   :  { %2393 = vadd.xlane.f32.xlu1 %v2392_v42  ;;  %2369 = vadd.xlane.f32.xlu0 %v2368_v36  ;;  %v2280_v54 = vmul.f32 0.2, %v2264_v18  ;;  %v2289_v57 = vmul.f32 0.2, %v2273_v43  ;;  %v2281_v5 = vmul.f32 0.2, %v2265_v35  ;;  %v2244_v28 = vmul.f32 %v4408_v1, %v2222_v6 }
 0x2eb   :  { %v2319_v51 = vadd.f32 %v2303_v44, %v3676_v25  ;;  %v2295_v27 = vmax.f32 %v2263_v14, %v2279_v20  ;;  %v2320_v26 = vadd.f32 %v2304_v34, %v3540_v53  ;;  %v2290_v23 = vmul.f32 0.2, %v2274_v60 }
 0x2ec   :  { %v2296_v40 = vmax.f32 %v2264_v18, %v2280_v54  ;;  %v2305_v49 = vmax.f32 %v2273_v43, %v2289_v57  ;;  %v2297_v61 = vmax.f32 %v2265_v35, %v2281_v5  ;;  %v2266_v55 = vadd.f32 %v4419_v3, %v2244_v28 }
 0x2ed   :  { %v2335_v15 = vmul.f32 0.70710677, %v2319_v51  ;;  %v2311_v59 = vadd.f32 %v2295_v27, %v3550_v63  ;;  %v2336_v9 = vmul.f32 0.70710677, %v2320_v26  ;;  %v2306_v47 = vmax.f32 %v2274_v60, %v2290_v23 }
 0x2ee   :  { %2396 = vadd.xlane.f32.xlu1 %v2395_v0  ;;  %2372 = vadd.xlane.f32.xlu0 %v2371_v41  ;;  %v2312_v1 = vadd.f32 %v2296_v40, %v3554_v21  ;;  %v2321_v25 = vadd.f32 %v2305_v49, %v3703_v38  ;;  %v2282_v2 = vmul.f32 0.2, %v2266_v55  ;;  %v2313_v24 = vadd.f32 %v2297_v61, %v3625_v56 }
 0x2ef   :  { %v2358_v53 = vmul.f32 %v4449_v29, %v2335_v15  ;;  %v2327_v19 = vmul.f32 0.70710677, %v2311_v59  ;;  %v2359_v62 = vmul.f32 %v4449_v29, %v2336_v9  ;;  %v2322_v13 = vadd.f32 %v2306_v47, %v3658_v12 }
 0x2f0   :  { %v2328_v3 = vmul.f32 0.70710677, %v2312_v1  ;;  %v2298_v39 = vmax.f32 %v2266_v55, %v2282_v2  ;;  %v2337_v42 = vmul.f32 0.70710677, %v2321_v25  ;;  %v2329_v36 = vmul.f32 0.70710677, %v2313_v24 }
 0x2f1   :  { %v2398_v63 = vsel %vm89_vm0, %v2358_v53, 0.0  ;;  %v2350_v22 = vmul.f32 %v4449_v29, %v2327_v19  ;;  %v2401_v56 = vsel %vm89_vm0, %v2359_v62, 0.0  ;;  %v2338_v52 = vmul.f32 0.70710677, %v2322_v13 }
 0x2f2   :  { %2399 = vadd.xlane.f32.xlu1 %v2398_v63  ;;  %v2351_v38 = vmul.f32 %v4449_v29, %v2328_v3  ;;  %v2314_v50 = vadd.f32 %v2298_v39, %v3560_v10  ;;  %v2360_v45 = vmul.f32 %v4449_v29, %v2337_v42  ;;  %v2352_v11 = vmul.f32 %v4449_v29, %v2329_v36 }
 0x2f3   :  { %v2374_v21 = vsel %vm89_vm0, %v2350_v22, 0.0  ;;  %v2361_v8 = vmul.f32 %v4449_v29, %v2338_v52  ;;  %v4585_v6 = vlaneseq }
 0x2f4   :  { %2375 = vadd.xlane.f32.xlu0 %v2374_v21  ;;  %v2377_v0 = vsel %vm89_vm0, %v2351_v38, 0.0  ;;  %v2330_v12 = vmul.f32 0.70710677, %v2314_v50  ;;  %v2404_v31 = vsel %vm89_vm0, %v2360_v45, 0.0  ;;  %v2380_v10 = vsel %vm89_vm0, %v2352_v11, 0.0 }
 0x2f5   :  { %v2407_v37 = vsel %vm89_vm0, %v2361_v8, 0.0  ;;  %v2453_v44 = vand.u32 127, %v4585_v6 }
 0x2f6   :  { %2402 = vadd.xlane.f32.xlu1 %v2401_v56  ;;  %v2353_v30 = vmul.f32 %v4449_v29, %v2330_v12 }
 0x2f7   :  { %v2458_v34 = vadd.s32 4294967288, %v2453_v44  ;;  %v2465_v60 = vadd.s32 4294967280, %v2453_v44  ;;  %v2472_v57 = vadd.s32 4294967272, %v2453_v44  ;;  %v2479_v5 = vadd.s32 4294967264, %v2453_v44 }
 0x2f8   :  { %2378 = vadd.xlane.f32.xlu0 %v2377_v0  ;;  %v2383_v32 = vsel %vm89_vm0, %v2353_v30, 0.0  ;;  %v2456_v28 = vsub.s32 %v2453_v44, %v3499_v4  ;;  %v2486_v51 = vadd.s32 4294967256, %v2453_v44  ;;  %v2493_v23 = vadd.s32 4294967248, %v2453_v44 }
 0x2f9   :  { %v2461_v27 = vsub.s32 %v2458_v34, %v3499_v4  ;;  %v2468_v26 = vsub.s32 %v2465_v60, %v3499_v4  ;;  %v2475_v49 = vsub.s32 %v2472_v57, %v3499_v4  ;;  %v2500_v61 = vadd.s32 4294967240, %v2453_v44 }
 0x2fa   :  { %2405 = vadd.xlane.f32.xlu1 %v2404_v31  ;;  %v2482_v47 = vsub.s32 %v2479_v5, %v3499_v4  ;;  %v2489_v25 = vsub.s32 %v2486_v51, %v3499_v4  ;;  %v2496_v24 = vsub.s32 %v2493_v23, %v3499_v4  ;;  %vm2549_vm0 = vcmask 517120  }
 0x2fb   :  { %v2503_v63 = vsub.s32 %v2500_v61, %v3499_v4 }
 0x2fc   :  { %2381 = vadd.xlane.f32.xlu0 %v2380_v10 }
 0x2fe   :  { %2408 = vadd.xlane.f32.xlu1 %v2407_v37 }
 0x300   :  { %2384 = vadd.xlane.f32.xlu0 %v2383_v32 }
 0x316   :  { %2417 = vperm.xlu0 %3135, %v2704_v58  }
 0x36f   :  { %v2364_v41 = vpop.xlane.xlu0 %2363  ;;  %v2388_v7 = vpop.xlane.xlu1 %2387 }
 0x373   :  { %v2367_v33 = vpop.xlane.xlu0 %2366  ;;  %v2391_v46 = vpop.xlane.xlu1 %2390 }
 0x377   :  { %v2370_v16 = vpop.xlane.xlu0 %2369  ;;  %v2394_v17 = vpop.xlane.xlu1 %2393 }
 0x37b   :  { %v2373_v14 = vpop.xlane.xlu0 %2372  ;;  %v2397_v18 = vpop.xlane.xlu1 %2396 }
 0x37f   :  { %v2400_v29 = vpop.xlane.xlu1 %2399 }
 0x381   :  { %v2376_v48 = vpop.xlane.xlu0 %2375 }
 0x383   :  { %v2403_v20 = vpop.xlane.xlu1 %2402 }
 0x385   :  { %v2379_v43 = vpop.xlane.xlu0 %2378 }
 0x387   :  { %v2406_v55 = vpop.xlane.xlu1 %2405 }
 0x389   :  { %v2382_v35 = vpop.xlane.xlu0 %2381 }
 0x38b   :  { %v2409_v45 = vpop.xlane.xlu1 %2408 }
 0x38d   :  { %v2385_v54 = vpop.xlane.xlu0 %2384 }
 0x395   :  { %v2418_v40 = vpop.permute.xlu0 %2417 }
 0x396   :  { %v2420_v15 = vadd.f32 %v2418_v40, %v2364_v41  ;;  %v2421_v59 = vadd.f32 %v2418_v40, %v2367_v33  ;;  %v2422_v9 = vadd.f32 %v2418_v40, %v2370_v16  ;;  %v2423_v1 = vadd.f32 %v2418_v40, %v2373_v14 }
 0x397   :  { %v2428_v2 = vadd.f32 %v2418_v40, %v2388_v7  ;;  %v2429_v53 = vadd.f32 %v2418_v40, %v2391_v46  ;;  %v2430_v19 = vadd.f32 %v2418_v40, %v2394_v17  ;;  %v2424_v62 = vadd.f32 %v2418_v40, %v2376_v48 }
 0x398   :  { %v2425_v3 = vadd.f32 %v2418_v40, %v2379_v43  ;;  %v2426_v39 = vadd.f32 %v2418_v40, %v2382_v35  ;;  %v2431_v22 = vadd.f32 %v2418_v40, %v2397_v18  ;;  %v2457_v42 = vrot.slane %v2420_v15, %v2456_v28 }
 0x399   :  { %v2462_v13 = vrot.slane %v2421_v59, %v2461_v27  ;;  %v2469_v21 = vrot.slane %v2422_v9, %v2468_v26  ;;  %v2427_v38 = vadd.f32 %v2418_v40, %v2385_v54  ;;  %v2432_v36 = vadd.f32 %v2418_v40, %v2400_v29 }
 0x39a   :  { %v2433_v50 = vadd.f32 %v2418_v40, %v2403_v20  ;;  %v2476_v56 = vrot.slane %v2423_v1, %v2475_v49  ;;  %v2510_v0 = vrot.slane %v2428_v2, %v2456_v28  ;;  %v2514_v11 = vrot.slane %v2429_v53, %v2461_v27 }
 0x39b   :  { %v2464_v52 = vsel %vm2463_vm8, %v2462_v13, %v2457_v42  ;;  %v2519_v12 = vrot.slane %v2430_v19, %v2468_v26  ;;  %v2434_v31 = vadd.f32 %v2418_v40, %v2406_v55  ;;  %v2435_v8 = vadd.f32 %v2418_v40, %v2409_v45 }
 0x39c   :  { %v2471_v10 = vsel %vm2470_vm9, %v2469_v21, %v2464_v52  ;;  %v2483_v30 = vrot.slane %v2424_v62, %v2482_v47  ;;  %v2490_v37 = vrot.slane %v2425_v3, %v2489_v25  ;;  %v2515_v32 = vsel %vm2463_vm8, %v2514_v11, %v2510_v0 }
 0x39d   :  { %v2478_v4 = vsel %vm2477_vm10, %v2476_v56, %v2471_v10  ;;  %v2524_v58 = vrot.slane %v2431_v22, %v2475_v49  ;;  %v2497_v7 = vrot.slane %v2426_v39, %v2496_v24  ;;  %v2520_v33 = vsel %vm2470_vm9, %v2519_v12, %v2515_v32 }
 0x39e   :  { %v2485_v41 = vsel %vm2484_vm11, %v2483_v30, %v2478_v4  ;;  %v2529_v16 = vrot.slane %v2432_v36, %v2482_v47  ;;  %v2504_v14 = vrot.slane %v2427_v38, %v2503_v63  ;;  %v2534_v48 = vrot.slane %v2433_v50, %v2489_v25 }
 0x39f   :  { %v2492_v46 = vsel %vm2491_vm12, %v2490_v37, %v2485_v41  ;;  %v2525_v17 = vsel %vm2477_vm10, %v2524_v58, %v2520_v33  ;;  %v2539_v29 = vrot.slane %v2434_v31, %v2496_v24  ;;  %v2544_v44 = vrot.slane %v2435_v8, %v2503_v63 }
 0x3a0   :  { %v2499_v18 = vsel %vm2498_vm13, %v2497_v7, %v2492_v46  ;;  %v2530_v43 = vsel %vm2484_vm11, %v2529_v16, %v2525_v17 }
 0x3a1   :  { %v2506_v35 = vsel %vm2505_vm14, %v2504_v14, %v2499_v18  ;;  %v2535_v6 = vsel %vm2491_vm12, %v2534_v48, %v2530_v43 }
 0x3a2   :  { %v2540_v20 = vsel %vm2498_vm13, %v2539_v29, %v2535_v6 }
 0x3a3   :  { %v2545_v34 = vsel %vm2505_vm14, %v2544_v44, %v2540_v20 }
 0x3a4   :  { %v2547_v60 = vsel %vm2546_vm15, %v2545_v34, %v2506_v35 }
 0x3a5   :  { %2550 = vst.msk [vmem:[#allocation3] sm:$0x3] %vm2549_vm0, %v2547_v60 }
 0x3a6   :  { %3171 = shalt.err (!%p3168_p4)
}
 0x3a7   :  { %s3172_s13 = scalar_lea.hbm %s4583_s11, 32 }
 0x3a8   :  { %p3173_p5 = scmp.ne.s32.totalorder %s4583_s11, %s3172_s13  ;;  %p3176_p6 = scmp.lt.u32.totalorder %s3172_s13, %s4583_s11 }
 0x3aa   :  { %p3178_p7 = pnand %p3176_p6, %p3173_p5 }
 0x3ac   :  { %3181 = shalt.err (!%p3178_p7)
}
 0x3ad   :  { %2560 = dma.vmem_to_hbm [thread:$0]  %s2558_s29, 32, %s4583_s11, [#allocation4]  }
 0x3ae   :  { %3182 = dma.done.wait [#allocation4], 32  }
 0x3af   :  { %3183 = vsyncadd [#allocation4], 4294967264 }
 0x3b0   :  { %2564 = vsyncpa [#allocation4], 1 }

</bundles_post_ra>
